<compile_context>
chip_gen: v7x
topology: tpu7x:2x2x1
jax: 0.10.0
libtpu: 0.0.40
codegen_flags: <defaults>
</compile_context>

<pallas_src>
import jax
import jax.numpy as jnp
from jax import lax
from jax.experimental import pallas as pl
from jax.experimental.pallas import tpu as pltpu

HIDDEN = 80    # nn.LSTM(1, 80, 1)
HPAD = 128     # hidden padded to full lane width
INPUT = 1
OUT = 1        # nn.Linear(80, 1)
_UNROLL_T = 16  # fully unroll the time loop up to this many steps


def _lstm_kernel(x_ref, wih_ref, b_ref, wbig_ref, wlin_ref, blin_ref, out_ref):
    """x_ref:    (T, BB, 1)  f32      raw input, batch-padded
       wih_ref:  (1, 4*HP)   f32      input weight, padded lanes zero
       b_ref:    (1, 4*HP)   f32      b_ih + b_hh, padded lanes zero
       wbig_ref: (HP, 4*HP)  f32/bf16 fused recurrent weight (gates = h @ W_big)
       wlin_ref: (1, HP)     f32      final linear weight (padded lanes zero)
       blin_ref: (1, 1)      f32      final linear bias (SMEM scalar)
       out_ref:  (BB, 1)     f32
    """
    T, BB, _ = x_ref.shape
    HP = wbig_ref.shape[0]

    wih = wih_ref[...]          # (1, 4*HP), hoisted out of the recurrence
    bias = b_ref[...]           # (1, 4*HP)
    wdt = wbig_ref.dtype

    def step(t, carry):
        h, c = carry
        x_t = x_ref[t]          # (BB, 1)
        # One fused, lane-dense (BB,128)x(128,512) MXU matmul per step plus
        # two cheap VPU broadcast passes for the input projection + bias.
        gates = (x_t * wih + bias
                 + jnp.dot(h.astype(wdt), wbig_ref[...],
                           preferred_element_type=jnp.float32))
        # PyTorch gate order: i, f, g, o (static lane slices at 128 multiples)
        i = jax.nn.sigmoid(gates[:, 0 * HP:1 * HP])
        f = jax.nn.sigmoid(gates[:, 1 * HP:2 * HP])
        g = jnp.tanh(gates[:, 2 * HP:3 * HP])
        o = jax.nn.sigmoid(gates[:, 3 * HP:4 * HP])
        c = f * c + i * g
        h = o * jnp.tanh(c)
        return h, c

    h = jnp.zeros((BB, HP), jnp.float32)
    c = jnp.zeros((BB, HP), jnp.float32)
    if T <= _UNROLL_T:
        # Short sequence: static unroll lets the scheduler overlap the MXU
        # push of step t with the EUP/VPU tail of step t-1.
        for t in range(T):
            h, c = step(t, (h, c))
    else:
        # Long sequence: bounded live ranges / instruction memory.
        h, c = lax.fori_loop(0, T, step, (h, c), unroll=4)

    # Linear(80, 1): VPU multiply + lane reduce (exact: padded lanes of h and
    # of w_lin are both zero), bias comes from SMEM.
    out_ref[...] = (jnp.sum(h * wlin_ref[...], axis=-1, keepdims=True)
                    + blin_ref[0, 0])


def _round_up(x, m):
    return -(-x // m) * m


def _tensorcores_per_chip():
    """Best-effort TC-per-chip detection (v7x megacore); safe default 1."""
    try:
        kind = jax.devices()[0].device_kind.lower()
    except Exception:
        return 1
    return 2 if "v7" in kind else 1


def _choose_batch_block(b_pad8, n_tc):
    """Cap BB at 64 (vreg pressure); split >=2 ways on multi-TC chips."""
    bb_cap = 64
    if n_tc >= 2 and b_pad8 >= 16:
        bb = _round_up(-(-b_pad8 // n_tc), 8)
        return min(bb_cap, bb)
    return min(bb_cap, b_pad8)


def lstm_model_forward(src, params, *, weights_dtype=jnp.bfloat16):
    """src: (B, T, 1) float32 (batch_first, like PyTorch). Returns (B, 1)."""
    src = src.astype(jnp.float32)
    B, T, F = src.shape
    assert F == INPUT
    H, HP = HIDDEN, HPAD
    G = 4 * HP

    w_ih, w_hh = params["w_ih"], params["w_hh"]
    b_ih, b_hh = params["b_ih"], params["b_hh"]
    w_lin, b_lin = params["w_lin"], params["b_lin"]

    # ---- repack + zero-pad parameters (PyTorch gate order i, f, g, o) ----
    # W_big[in, k*HP + j] = w_hh[k*H + j, in]  ->  (h @ W_big) == h @ W_hh^T
    whh_t = w_hh.reshape(4, H, H).transpose(0, 2, 1)            # (gate, in, out)
    whh_p = jnp.pad(whh_t, ((0, 0), (0, HP - H), (0, HP - H)))  # (4, HP, HP)
    wbig = whh_p.transpose(1, 0, 2).reshape(HP, G).astype(weights_dtype)

    wih_p = jnp.pad(w_ih.reshape(4, H), ((0, 0), (0, HP - H))).reshape(1, G)
    b_p = jnp.pad((b_ih + b_hh).reshape(4, H),
                  ((0, 0), (0, HP - H))).reshape(1, G)
    wih_p = wih_p.astype(jnp.float32)
    b_p = b_p.astype(jnp.float32)

    wlin_p = jnp.pad(w_lin, ((0, 0), (0, HP - H))).astype(jnp.float32)  # (1, HP)
    blin = b_lin.reshape(1, 1).astype(jnp.float32)

    # ---- raw input, time-major, batch padded to the block size ----
    x_tm = jnp.transpose(src[..., 0], (1, 0))[:, :, None]       # (T, B, 1)

    b_pad8 = _round_up(B, 8)
    BB = _choose_batch_block(b_pad8, _tensorcores_per_chip())
    B_pad = _round_up(B, BB)
    if B_pad != B:
        x_tm = jnp.pad(x_tm, ((0, 0), (0, B_pad - B), (0, 0)))
    grid = (B_pad // BB,)

    out = pl.pallas_call(
        _lstm_kernel,
        out_shape=jax.ShapeDtypeStruct((B_pad, OUT), jnp.float32),
        grid=grid,
        in_specs=[
            pl.BlockSpec((T, BB, 1), lambda i: (0, i, 0)),                    # x
            pl.BlockSpec((1, G), lambda i: (0, 0)),                           # w_ih
            pl.BlockSpec((1, G), lambda i: (0, 0)),                           # bias
            pl.BlockSpec((HP, G), lambda i: (0, 0)),                          # W_big
            pl.BlockSpec((1, HP), lambda i: (0, 0)),                          # w_lin
            pl.BlockSpec((1, 1), lambda i: (0, 0), memory_space=pltpu.SMEM),  # b_lin
        ],
        out_specs=pl.BlockSpec((BB, OUT), lambda i: (i, 0)),
        compiler_params=pltpu.CompilerParams(
            dimension_semantics=("parallel",)),
    )(x_tm, wih_p, b_p, wbig, wlin_p, blin)
    return out[:B]


def init_params(key):
    """Deterministic init matching the PyTorch module's parameter shapes."""
    H = HIDDEN
    k1, k2, k3, k4, k5, k6 = jax.random.split(key, 6)
    bound = 1.0 / jnp.sqrt(H)
    return {
        "w_ih": jax.random.uniform(k1, (4 * H, INPUT), jnp.float32, -bound, bound),
        "w_hh": jax.random.uniform(k2, (4 * H, H), jnp.float32, -bound, bound),
        "b_ih": jax.random.uniform(k3, (4 * H,), jnp.float32, -bound, bound),
        "b_hh": jax.random.uniform(k4, (4 * H,), jnp.float32, -bound, bound),
        "w_lin": jax.random.uniform(k5, (OUT, H), jnp.float32, -bound, bound),
        "b_lin": jax.random.uniform(k6, (OUT,), jnp.float32, -bound, bound),
    }


def _reference(src, p):
    """Pure-JAX reference of the same forward pass (PyTorch semantics)."""
    B, T, _ = src.shape
    H = HIDDEN
    h = jnp.zeros((B, H), jnp.float32)
    c = jnp.zeros((B, H), jnp.float32)
    for t in range(T):
        x_t = src[:, t, :]                                     # (B, 1)
        gates = x_t @ p["w_ih"].T + h @ p["w_hh"].T + p["b_ih"] + p["b_hh"]
        i, f, g, o = jnp.split(gates, 4, axis=-1)
        i, f, o = jax.nn.sigmoid(i), jax.nn.sigmoid(f), jax.nn.sigmoid(o)
        g = jnp.tanh(g)
        c = f * c + i * g
        h = o * jnp.tanh(c)
    return h @ p["w_lin"].T + p["b_lin"]


if __name__ == "__main__":
    key = jax.random.PRNGKey(0)
    pkey, xkey = jax.random.split(key)
    params = init_params(pkey)

    # --- small base case: B=8, T=8 ---
    B, T = 8, 8
    src = jax.random.normal(xkey, (B, T, INPUT), jnp.float32)
    ref = _reference(src, params)

    # f32 recurrent weights: tight check.
    out_f32 = jax.block_until_ready(
        lstm_model_forward(src, params, weights_dtype=jnp.float32))
    assert out_f32.shape == (B, OUT)
    assert jnp.allclose(out_f32, ref, atol=1e-4, rtol=1e-4), "f32 kernel mismatch"

    # default bf16 recurrent weights (f32 state / accumulation): loose check.
    out_bf16 = jax.block_until_ready(lstm_model_forward(src, params))
    assert jnp.allclose(out_bf16, ref, atol=5e-2, rtol=5e-2), "bf16 kernel mismatch"

    # --- larger batch: exercises the batch-blocked ("parallel",) grid ---
    B2 = 80
    src2 = jax.random.normal(jax.random.PRNGKey(1), (B2, T, INPUT), jnp.float32)
    ref2 = _reference(src2, params)
    out2 = jax.block_until_ready(
        lstm_model_forward(src2, params, weights_dtype=jnp.float32))
    assert out2.shape == (B2, OUT)
    assert jnp.allclose(out2, ref2, atol=1e-4, rtol=1e-4), "grid path mismatch"

    # --- longer sequence: exercises the lax.fori_loop(unroll=4) path ---
    T3 = 24
    src3 = jax.random.normal(jax.random.PRNGKey(2), (B, T3, INPUT), jnp.float32)
    ref3 = _reference(src3, params)
    out3 = jax.block_until_ready(
        lstm_model_forward(src3, params, weights_dtype=jnp.float32))
    assert jnp.allclose(out3, ref3, atol=1e-3, rtol=1e-3), "fori_loop path mismatch"

    print("KERNEL_OK")
</pallas_src>

<mosaic_0001>
module attributes {stable_mosaic.version = 11 : i64} {
  func.func @_lstm_kernel(%arg0: i32, %arg1: memref<8x8x1xf32, #tpu.memory_space<vmem>>, %arg2: memref<1x512xf32, #tpu.memory_space<vmem>>, %arg3: memref<1x512xf32, #tpu.memory_space<vmem>>, %arg4: memref<128x512xf32, #tpu.memory_space<vmem>>, %arg5: memref<1x128xf32, #tpu.memory_space<vmem>>, %arg6: memref<1x1xf32, #tpu.memory_space<smem>>, %arg7: memref<8x1xf32, #tpu.memory_space<vmem>>) attributes {dimension_semantics = [#tpu.dimension_semantics<parallel>], iteration_bounds = array<i64: 1>, scalar_prefetch = 0 : i64, scratch_operands = 0 : i64, tpu.core_type = #tpu.core_type<tc>, window_params = [{transform_indices = @transform_0, window_bounds = array<i64: 8, 8, 1>}, {pipeline_mode = #tpu.pipeline_mode<synchronous>, transform_indices = @transform_1, window_bounds = array<i64: 1, 512>}, {pipeline_mode = #tpu.pipeline_mode<synchronous>, transform_indices = @transform_2, window_bounds = array<i64: 1, 512>}, {pipeline_mode = #tpu.pipeline_mode<synchronous>, transform_indices = @transform_3, window_bounds = array<i64: 128, 512>}, {pipeline_mode = #tpu.pipeline_mode<synchronous>, transform_indices = @transform_4, window_bounds = array<i64: 1, 128>}, {transform_indices = @transform_5, window_bounds = array<i64: 1, 1>}, {transform_indices = @transform_6, window_bounds = array<i64: 8, 1>}]} {
    %c0 = arith.constant 0 : index
    %c0_0 = arith.constant 0 : index
    %0 = vector.load %arg2[%c0, %c0_0] : memref<1x512xf32, #tpu.memory_space<vmem>>, vector<1x512xf32>
    %c0_1 = arith.constant 0 : index
    %c0_2 = arith.constant 0 : index
    %1 = vector.load %arg3[%c0_1, %c0_2] : memref<1x512xf32, #tpu.memory_space<vmem>>, vector<1x512xf32>
    %cst = arith.constant 0.000000e+00 : f32
    %2 = vector.broadcast %cst : f32 to vector<8x128xf32>
    %cst_3 = arith.constant 0.000000e+00 : f32
    %3 = vector.broadcast %cst_3 : f32 to vector<8x128xf32>
    %c0_4 = arith.constant 0 : index
    %c0_5 = arith.constant 0 : index
    %c0_6 = arith.constant 0 : index
    %4 = vector.load %arg1[%c0_4, %c0_5, %c0_6] : memref<8x8x1xf32, #tpu.memory_space<vmem>>, vector<1x8x1xf32>
    %5 = vector.shape_cast %4 : vector<1x8x1xf32> to vector<8x1xf32>
    %6 = vector.broadcast %5 : vector<8x1xf32> to vector<8x512xf32>
    %7 = vector.broadcast %0 : vector<1x512xf32> to vector<8x512xf32>
    %8 = arith.mulf %6, %7 : vector<8x512xf32>
    %9 = vector.broadcast %1 : vector<1x512xf32> to vector<8x512xf32>
    %10 = arith.addf %8, %9 : vector<8x512xf32>
    %c0_7 = arith.constant 0 : index
    %c0_8 = arith.constant 0 : index
    %11 = vector.load %arg4[%c0_7, %c0_8] : memref<128x512xf32, #tpu.memory_space<vmem>>, vector<128x512xf32>
    %cst_9 = arith.constant dense<0.000000e+00> : vector<8x512xf32>
    %12 = tpu.matmul %2, %11, %cst_9 {dimension_numbers = #tpu.dot_dimension_numbers<[1], [0], [0], [1], [0, 0, 1, 1], [], []>} : vector<8x128xf32>, vector<128x512xf32>, vector<8x512xf32> -> vector<8x512xf32>
    %13 = arith.addf %10, %12 : vector<8x512xf32>
    %14 = vector.extract_strided_slice %13 {offsets = [0, 0], sizes = [8, 128], strides = [1, 1]} : vector<8x512xf32> to vector<8x128xf32>
    %15 = arith.negf %14 : vector<8x128xf32>
    %16 = math.exp %15 : vector<8x128xf32>
    %cst_10 = arith.constant 1.000000e+00 : f32
    %17 = vector.broadcast %cst_10 : f32 to vector<8x128xf32>
    %18 = arith.addf %17, %16 : vector<8x128xf32>
    %19 = arith.divf %17, %18 : vector<8x128xf32>
    %20 = vector.extract_strided_slice %13 {offsets = [0, 128], sizes = [8, 128], strides = [1, 1]} : vector<8x512xf32> to vector<8x128xf32>
    %21 = arith.negf %20 : vector<8x128xf32>
    %22 = math.exp %21 : vector<8x128xf32>
    %cst_11 = arith.constant 1.000000e+00 : f32
    %23 = vector.broadcast %cst_11 : f32 to vector<8x128xf32>
    %24 = arith.addf %23, %22 : vector<8x128xf32>
    %25 = arith.divf %23, %24 : vector<8x128xf32>
    %26 = vector.extract_strided_slice %13 {offsets = [0, 256], sizes = [8, 128], strides = [1, 1]} : vector<8x512xf32> to vector<8x128xf32>
    %27 = math.tanh %26 : vector<8x128xf32>
    %28 = vector.extract_strided_slice %13 {offsets = [0, 384], sizes = [8, 128], strides = [1, 1]} : vector<8x512xf32> to vector<8x128xf32>
    %29 = arith.negf %28 : vector<8x128xf32>
    %30 = math.exp %29 : vector<8x128xf32>
    %cst_12 = arith.constant 1.000000e+00 : f32
    %31 = vector.broadcast %cst_12 : f32 to vector<8x128xf32>
    %32 = arith.addf %31, %30 : vector<8x128xf32>
    %33 = arith.divf %31, %32 : vector<8x128xf32>
    %34 = arith.mulf %25, %3 : vector<8x128xf32>
    %35 = arith.mulf %19, %27 : vector<8x128xf32>
    %36 = arith.addf %34, %35 : vector<8x128xf32>
    %37 = math.tanh %36 : vector<8x128xf32>
    %38 = arith.mulf %33, %37 : vector<8x128xf32>
    %c1 = arith.constant 1 : index
    %c0_13 = arith.constant 0 : index
    %c0_14 = arith.constant 0 : index
    %39 = vector.load %arg1[%c1, %c0_13, %c0_14] : memref<8x8x1xf32, #tpu.memory_space<vmem>>, vector<1x8x1xf32>
    %40 = vector.shape_cast %39 : vector<1x8x1xf32> to vector<8x1xf32>
    %41 = vector.broadcast %40 : vector<8x1xf32> to vector<8x512xf32>
    %42 = vector.broadcast %0 : vector<1x512xf32> to vector<8x512xf32>
    %43 = arith.mulf %41, %42 : vector<8x512xf32>
    %44 = vector.broadcast %1 : vector<1x512xf32> to vector<8x512xf32>
    %45 = arith.addf %43, %44 : vector<8x512xf32>
    %c0_15 = arith.constant 0 : index
    %c0_16 = arith.constant 0 : index
    %46 = vector.load %arg4[%c0_15, %c0_16] : memref<128x512xf32, #tpu.memory_space<vmem>>, vector<128x512xf32>
    %cst_17 = arith.constant dense<0.000000e+00> : vector<8x512xf32>
    %47 = tpu.matmul %38, %46, %cst_17 {dimension_numbers = #tpu.dot_dimension_numbers<[1], [0], [0], [1], [0, 0, 1, 1], [], []>} : vector<8x128xf32>, vector<128x512xf32>, vector<8x512xf32> -> vector<8x512xf32>
    %48 = arith.addf %45, %47 : vector<8x512xf32>
    %49 = vector.extract_strided_slice %48 {offsets = [0, 0], sizes = [8, 128], strides = [1, 1]} : vector<8x512xf32> to vector<8x128xf32>
    %50 = arith.negf %49 : vector<8x128xf32>
    %51 = math.exp %50 : vector<8x128xf32>
    %cst_18 = arith.constant 1.000000e+00 : f32
    %52 = vector.broadcast %cst_18 : f32 to vector<8x128xf32>
    %53 = arith.addf %52, %51 : vector<8x128xf32>
    %54 = arith.divf %52, %53 : vector<8x128xf32>
    %55 = vector.extract_strided_slice %48 {offsets = [0, 128], sizes = [8, 128], strides = [1, 1]} : vector<8x512xf32> to vector<8x128xf32>
    %56 = arith.negf %55 : vector<8x128xf32>
    %57 = math.exp %56 : vector<8x128xf32>
    %cst_19 = arith.constant 1.000000e+00 : f32
    %58 = vector.broadcast %cst_19 : f32 to vector<8x128xf32>
    %59 = arith.addf %58, %57 : vector<8x128xf32>
    %60 = arith.divf %58, %59 : vector<8x128xf32>
    %61 = vector.extract_strided_slice %48 {offsets = [0, 256], sizes = [8, 128], strides = [1, 1]} : vector<8x512xf32> to vector<8x128xf32>
    %62 = math.tanh %61 : vector<8x128xf32>
    %63 = vector.extract_strided_slice %48 {offsets = [0, 384], sizes = [8, 128], strides = [1, 1]} : vector<8x512xf32> to vector<8x128xf32>
    %64 = arith.negf %63 : vector<8x128xf32>
    %65 = math.exp %64 : vector<8x128xf32>
    %cst_20 = arith.constant 1.000000e+00 : f32
    %66 = vector.broadcast %cst_20 : f32 to vector<8x128xf32>
    %67 = arith.addf %66, %65 : vector<8x128xf32>
    %68 = arith.divf %66, %67 : vector<8x128xf32>
    %69 = arith.mulf %60, %36 : vector<8x128xf32>
    %70 = arith.mulf %54, %62 : vector<8x128xf32>
    %71 = arith.addf %69, %70 : vector<8x128xf32>
    %72 = math.tanh %71 : vector<8x128xf32>
    %73 = arith.mulf %68, %72 : vector<8x128xf32>
    %c2 = arith.constant 2 : index
    %c0_21 = arith.constant 0 : index
    %c0_22 = arith.constant 0 : index
    %74 = vector.load %arg1[%c2, %c0_21, %c0_22] : memref<8x8x1xf32, #tpu.memory_space<vmem>>, vector<1x8x1xf32>
    %75 = vector.shape_cast %74 : vector<1x8x1xf32> to vector<8x1xf32>
    %76 = vector.broadcast %75 : vector<8x1xf32> to vector<8x512xf32>
    %77 = vector.broadcast %0 : vector<1x512xf32> to vector<8x512xf32>
    %78 = arith.mulf %76, %77 : vector<8x512xf32>
    %79 = vector.broadcast %1 : vector<1x512xf32> to vector<8x512xf32>
    %80 = arith.addf %78, %79 : vector<8x512xf32>
    %c0_23 = arith.constant 0 : index
    %c0_24 = arith.constant 0 : index
    %81 = vector.load %arg4[%c0_23, %c0_24] : memref<128x512xf32, #tpu.memory_space<vmem>>, vector<128x512xf32>
    %cst_25 = arith.constant dense<0.000000e+00> : vector<8x512xf32>
    %82 = tpu.matmul %73, %81, %cst_25 {dimension_numbers = #tpu.dot_dimension_numbers<[1], [0], [0], [1], [0, 0, 1, 1], [], []>} : vector<8x128xf32>, vector<128x512xf32>, vector<8x512xf32> -> vector<8x512xf32>
    %83 = arith.addf %80, %82 : vector<8x512xf32>
    %84 = vector.extract_strided_slice %83 {offsets = [0, 0], sizes = [8, 128], strides = [1, 1]} : vector<8x512xf32> to vector<8x128xf32>
    %85 = arith.negf %84 : vector<8x128xf32>
    %86 = math.exp %85 : vector<8x128xf32>
    %cst_26 = arith.constant 1.000000e+00 : f32
    %87 = vector.broadcast %cst_26 : f32 to vector<8x128xf32>
    %88 = arith.addf %87, %86 : vector<8x128xf32>
    %89 = arith.divf %87, %88 : vector<8x128xf32>
    %90 = vector.extract_strided_slice %83 {offsets = [0, 128], sizes = [8, 128], strides = [1, 1]} : vector<8x512xf32> to vector<8x128xf32>
    %91 = arith.negf %90 : vector<8x128xf32>
    %92 = math.exp %91 : vector<8x128xf32>
    %cst_27 = arith.constant 1.000000e+00 : f32
    %93 = vector.broadcast %cst_27 : f32 to vector<8x128xf32>
    %94 = arith.addf %93, %92 : vector<8x128xf32>
    %95 = arith.divf %93, %94 : vector<8x128xf32>
    %96 = vector.extract_strided_slice %83 {offsets = [0, 256], sizes = [8, 128], strides = [1, 1]} : vector<8x512xf32> to vector<8x128xf32>
    %97 = math.tanh %96 : vector<8x128xf32>
    %98 = vector.extract_strided_slice %83 {offsets = [0, 384], sizes = [8, 128], strides = [1, 1]} : vector<8x512xf32> to vector<8x128xf32>
    %99 = arith.negf %98 : vector<8x128xf32>
    %100 = math.exp %99 : vector<8x128xf32>
    %cst_28 = arith.constant 1.000000e+00 : f32
    %101 = vector.broadcast %cst_28 : f32 to vector<8x128xf32>
    %102 = arith.addf %101, %100 : vector<8x128xf32>
    %103 = arith.divf %101, %102 : vector<8x128xf32>
    %104 = arith.mulf %95, %71 : vector<8x128xf32>
    %105 = arith.mulf %89, %97 : vector<8x128xf32>
    %106 = arith.addf %104, %105 : vector<8x128xf32>
    %107 = math.tanh %106 : vector<8x128xf32>
    %108 = arith.mulf %103, %107 : vector<8x128xf32>
    %c3 = arith.constant 3 : index
    %c0_29 = arith.constant 0 : index
    %c0_30 = arith.constant 0 : index
    %109 = vector.load %arg1[%c3, %c0_29, %c0_30] : memref<8x8x1xf32, #tpu.memory_space<vmem>>, vector<1x8x1xf32>
    %110 = vector.shape_cast %109 : vector<1x8x1xf32> to vector<8x1xf32>
    %111 = vector.broadcast %110 : vector<8x1xf32> to vector<8x512xf32>
    %112 = vector.broadcast %0 : vector<1x512xf32> to vector<8x512xf32>
    %113 = arith.mulf %111, %112 : vector<8x512xf32>
    %114 = vector.broadcast %1 : vector<1x512xf32> to vector<8x512xf32>
    %115 = arith.addf %113, %114 : vector<8x512xf32>
    %c0_31 = arith.constant 0 : index
    %c0_32 = arith.constant 0 : index
    %116 = vector.load %arg4[%c0_31, %c0_32] : memref<128x512xf32, #tpu.memory_space<vmem>>, vector<128x512xf32>
    %cst_33 = arith.constant dense<0.000000e+00> : vector<8x512xf32>
    %117 = tpu.matmul %108, %116, %cst_33 {dimension_numbers = #tpu.dot_dimension_numbers<[1], [0], [0], [1], [0, 0, 1, 1], [], []>} : vector<8x128xf32>, vector<128x512xf32>, vector<8x512xf32> -> vector<8x512xf32>
    %118 = arith.addf %115, %117 : vector<8x512xf32>
    %119 = vector.extract_strided_slice %118 {offsets = [0, 0], sizes = [8, 128], strides = [1, 1]} : vector<8x512xf32> to vector<8x128xf32>
    %120 = arith.negf %119 : vector<8x128xf32>
    %121 = math.exp %120 : vector<8x128xf32>
    %cst_34 = arith.constant 1.000000e+00 : f32
    %122 = vector.broadcast %cst_34 : f32 to vector<8x128xf32>
    %123 = arith.addf %122, %121 : vector<8x128xf32>
    %124 = arith.divf %122, %123 : vector<8x128xf32>
    %125 = vector.extract_strided_slice %118 {offsets = [0, 128], sizes = [8, 128], strides = [1, 1]} : vector<8x512xf32> to vector<8x128xf32>
    %126 = arith.negf %125 : vector<8x128xf32>
    %127 = math.exp %126 : vector<8x128xf32>
    %cst_35 = arith.constant 1.000000e+00 : f32
    %128 = vector.broadcast %cst_35 : f32 to vector<8x128xf32>
    %129 = arith.addf %128, %127 : vector<8x128xf32>
    %130 = arith.divf %128, %129 : vector<8x128xf32>
    %131 = vector.extract_strided_slice %118 {offsets = [0, 256], sizes = [8, 128], strides = [1, 1]} : vector<8x512xf32> to vector<8x128xf32>
    %132 = math.tanh %131 : vector<8x128xf32>
    %133 = vector.extract_strided_slice %118 {offsets = [0, 384], sizes = [8, 128], strides = [1, 1]} : vector<8x512xf32> to vector<8x128xf32>
    %134 = arith.negf %133 : vector<8x128xf32>
    %135 = math.exp %134 : vector<8x128xf32>
    %cst_36 = arith.constant 1.000000e+00 : f32
    %136 = vector.broadcast %cst_36 : f32 to vector<8x128xf32>
    %137 = arith.addf %136, %135 : vector<8x128xf32>
    %138 = arith.divf %136, %137 : vector<8x128xf32>
    %139 = arith.mulf %130, %106 : vector<8x128xf32>
    %140 = arith.mulf %124, %132 : vector<8x128xf32>
    %141 = arith.addf %139, %140 : vector<8x128xf32>
    %142 = math.tanh %141 : vector<8x128xf32>
    %143 = arith.mulf %138, %142 : vector<8x128xf32>
    %c4 = arith.constant 4 : index
    %c0_37 = arith.constant 0 : index
    %c0_38 = arith.constant 0 : index
    %144 = vector.load %arg1[%c4, %c0_37, %c0_38] : memref<8x8x1xf32, #tpu.memory_space<vmem>>, vector<1x8x1xf32>
    %145 = vector.shape_cast %144 : vector<1x8x1xf32> to vector<8x1xf32>
    %146 = vector.broadcast %145 : vector<8x1xf32> to vector<8x512xf32>
    %147 = vector.broadcast %0 : vector<1x512xf32> to vector<8x512xf32>
    %148 = arith.mulf %146, %147 : vector<8x512xf32>
    %149 = vector.broadcast %1 : vector<1x512xf32> to vector<8x512xf32>
    %150 = arith.addf %148, %149 : vector<8x512xf32>
    %c0_39 = arith.constant 0 : index
    %c0_40 = arith.constant 0 : index
    %151 = vector.load %arg4[%c0_39, %c0_40] : memref<128x512xf32, #tpu.memory_space<vmem>>, vector<128x512xf32>
    %cst_41 = arith.constant dense<0.000000e+00> : vector<8x512xf32>
    %152 = tpu.matmul %143, %151, %cst_41 {dimension_numbers = #tpu.dot_dimension_numbers<[1], [0], [0], [1], [0, 0, 1, 1], [], []>} : vector<8x128xf32>, vector<128x512xf32>, vector<8x512xf32> -> vector<8x512xf32>
    %153 = arith.addf %150, %152 : vector<8x512xf32>
    %154 = vector.extract_strided_slice %153 {offsets = [0, 0], sizes = [8, 128], strides = [1, 1]} : vector<8x512xf32> to vector<8x128xf32>
    %155 = arith.negf %154 : vector<8x128xf32>
    %156 = math.exp %155 : vector<8x128xf32>
    %cst_42 = arith.constant 1.000000e+00 : f32
    %157 = vector.broadcast %cst_42 : f32 to vector<8x128xf32>
    %158 = arith.addf %157, %156 : vector<8x128xf32>
    %159 = arith.divf %157, %158 : vector<8x128xf32>
    %160 = vector.extract_strided_slice %153 {offsets = [0, 128], sizes = [8, 128], strides = [1, 1]} : vector<8x512xf32> to vector<8x128xf32>
    %161 = arith.negf %160 : vector<8x128xf32>
    %162 = math.exp %161 : vector<8x128xf32>
    %cst_43 = arith.constant 1.000000e+00 : f32
    %163 = vector.broadcast %cst_43 : f32 to vector<8x128xf32>
    %164 = arith.addf %163, %162 : vector<8x128xf32>
    %165 = arith.divf %163, %164 : vector<8x128xf32>
    %166 = vector.extract_strided_slice %153 {offsets = [0, 256], sizes = [8, 128], strides = [1, 1]} : vector<8x512xf32> to vector<8x128xf32>
    %167 = math.tanh %166 : vector<8x128xf32>
    %168 = vector.extract_strided_slice %153 {offsets = [0, 384], sizes = [8, 128], strides = [1, 1]} : vector<8x512xf32> to vector<8x128xf32>
    %169 = arith.negf %168 : vector<8x128xf32>
    %170 = math.exp %169 : vector<8x128xf32>
    %cst_44 = arith.constant 1.000000e+00 : f32
    %171 = vector.broadcast %cst_44 : f32 to vector<8x128xf32>
    %172 = arith.addf %171, %170 : vector<8x128xf32>
    %173 = arith.divf %171, %172 : vector<8x128xf32>
    %174 = arith.mulf %165, %141 : vector<8x128xf32>
    %175 = arith.mulf %159, %167 : vector<8x128xf32>
    %176 = arith.addf %174, %175 : vector<8x128xf32>
    %177 = math.tanh %176 : vector<8x128xf32>
    %178 = arith.mulf %173, %177 : vector<8x128xf32>
    %c5 = arith.constant 5 : index
    %c0_45 = arith.constant 0 : index
    %c0_46 = arith.constant 0 : index
    %179 = vector.load %arg1[%c5, %c0_45, %c0_46] : memref<8x8x1xf32, #tpu.memory_space<vmem>>, vector<1x8x1xf32>
    %180 = vector.shape_cast %179 : vector<1x8x1xf32> to vector<8x1xf32>
    %181 = vector.broadcast %180 : vector<8x1xf32> to vector<8x512xf32>
    %182 = vector.broadcast %0 : vector<1x512xf32> to vector<8x512xf32>
    %183 = arith.mulf %181, %182 : vector<8x512xf32>
    %184 = vector.broadcast %1 : vector<1x512xf32> to vector<8x512xf32>
    %185 = arith.addf %183, %184 : vector<8x512xf32>
    %c0_47 = arith.constant 0 : index
    %c0_48 = arith.constant 0 : index
    %186 = vector.load %arg4[%c0_47, %c0_48] : memref<128x512xf32, #tpu.memory_space<vmem>>, vector<128x512xf32>
    %cst_49 = arith.constant dense<0.000000e+00> : vector<8x512xf32>
    %187 = tpu.matmul %178, %186, %cst_49 {dimension_numbers = #tpu.dot_dimension_numbers<[1], [0], [0], [1], [0, 0, 1, 1], [], []>} : vector<8x128xf32>, vector<128x512xf32>, vector<8x512xf32> -> vector<8x512xf32>
    %188 = arith.addf %185, %187 : vector<8x512xf32>
    %189 = vector.extract_strided_slice %188 {offsets = [0, 0], sizes = [8, 128], strides = [1, 1]} : vector<8x512xf32> to vector<8x128xf32>
    %190 = arith.negf %189 : vector<8x128xf32>
    %191 = math.exp %190 : vector<8x128xf32>
    %cst_50 = arith.constant 1.000000e+00 : f32
    %192 = vector.broadcast %cst_50 : f32 to vector<8x128xf32>
    %193 = arith.addf %192, %191 : vector<8x128xf32>
    %194 = arith.divf %192, %193 : vector<8x128xf32>
    %195 = vector.extract_strided_slice %188 {offsets = [0, 128], sizes = [8, 128], strides = [1, 1]} : vector<8x512xf32> to vector<8x128xf32>
    %196 = arith.negf %195 : vector<8x128xf32>
    %197 = math.exp %196 : vector<8x128xf32>
    %cst_51 = arith.constant 1.000000e+00 : f32
    %198 = vector.broadcast %cst_51 : f32 to vector<8x128xf32>
    %199 = arith.addf %198, %197 : vector<8x128xf32>
    %200 = arith.divf %198, %199 : vector<8x128xf32>
    %201 = vector.extract_strided_slice %188 {offsets = [0, 256], sizes = [8, 128], strides = [1, 1]} : vector<8x512xf32> to vector<8x128xf32>
    %202 = math.tanh %201 : vector<8x128xf32>
    %203 = vector.extract_strided_slice %188 {offsets = [0, 384], sizes = [8, 128], strides = [1, 1]} : vector<8x512xf32> to vector<8x128xf32>
    %204 = arith.negf %203 : vector<8x128xf32>
    %205 = math.exp %204 : vector<8x128xf32>
    %cst_52 = arith.constant 1.000000e+00 : f32
    %206 = vector.broadcast %cst_52 : f32 to vector<8x128xf32>
    %207 = arith.addf %206, %205 : vector<8x128xf32>
    %208 = arith.divf %206, %207 : vector<8x128xf32>
    %209 = arith.mulf %200, %176 : vector<8x128xf32>
    %210 = arith.mulf %194, %202 : vector<8x128xf32>
    %211 = arith.addf %209, %210 : vector<8x128xf32>
    %212 = math.tanh %211 : vector<8x128xf32>
    %213 = arith.mulf %208, %212 : vector<8x128xf32>
    %c6 = arith.constant 6 : index
    %c0_53 = arith.constant 0 : index
    %c0_54 = arith.constant 0 : index
    %214 = vector.load %arg1[%c6, %c0_53, %c0_54] : memref<8x8x1xf32, #tpu.memory_space<vmem>>, vector<1x8x1xf32>
    %215 = vector.shape_cast %214 : vector<1x8x1xf32> to vector<8x1xf32>
    %216 = vector.broadcast %215 : vector<8x1xf32> to vector<8x512xf32>
    %217 = vector.broadcast %0 : vector<1x512xf32> to vector<8x512xf32>
    %218 = arith.mulf %216, %217 : vector<8x512xf32>
    %219 = vector.broadcast %1 : vector<1x512xf32> to vector<8x512xf32>
    %220 = arith.addf %218, %219 : vector<8x512xf32>
    %c0_55 = arith.constant 0 : index
    %c0_56 = arith.constant 0 : index
    %221 = vector.load %arg4[%c0_55, %c0_56] : memref<128x512xf32, #tpu.memory_space<vmem>>, vector<128x512xf32>
    %cst_57 = arith.constant dense<0.000000e+00> : vector<8x512xf32>
    %222 = tpu.matmul %213, %221, %cst_57 {dimension_numbers = #tpu.dot_dimension_numbers<[1], [0], [0], [1], [0, 0, 1, 1], [], []>} : vector<8x128xf32>, vector<128x512xf32>, vector<8x512xf32> -> vector<8x512xf32>
    %223 = arith.addf %220, %222 : vector<8x512xf32>
    %224 = vector.extract_strided_slice %223 {offsets = [0, 0], sizes = [8, 128], strides = [1, 1]} : vector<8x512xf32> to vector<8x128xf32>
    %225 = arith.negf %224 : vector<8x128xf32>
    %226 = math.exp %225 : vector<8x128xf32>
    %cst_58 = arith.constant 1.000000e+00 : f32
    %227 = vector.broadcast %cst_58 : f32 to vector<8x128xf32>
    %228 = arith.addf %227, %226 : vector<8x128xf32>
    %229 = arith.divf %227, %228 : vector<8x128xf32>
    %230 = vector.extract_strided_slice %223 {offsets = [0, 128], sizes = [8, 128], strides = [1, 1]} : vector<8x512xf32> to vector<8x128xf32>
    %231 = arith.negf %230 : vector<8x128xf32>
    %232 = math.exp %231 : vector<8x128xf32>
    %cst_59 = arith.constant 1.000000e+00 : f32
    %233 = vector.broadcast %cst_59 : f32 to vector<8x128xf32>
    %234 = arith.addf %233, %232 : vector<8x128xf32>
    %235 = arith.divf %233, %234 : vector<8x128xf32>
    %236 = vector.extract_strided_slice %223 {offsets = [0, 256], sizes = [8, 128], strides = [1, 1]} : vector<8x512xf32> to vector<8x128xf32>
    %237 = math.tanh %236 : vector<8x128xf32>
    %238 = vector.extract_strided_slice %223 {offsets = [0, 384], sizes = [8, 128], strides = [1, 1]} : vector<8x512xf32> to vector<8x128xf32>
    %239 = arith.negf %238 : vector<8x128xf32>
    %240 = math.exp %239 : vector<8x128xf32>
    %cst_60 = arith.constant 1.000000e+00 : f32
    %241 = vector.broadcast %cst_60 : f32 to vector<8x128xf32>
    %242 = arith.addf %241, %240 : vector<8x128xf32>
    %243 = arith.divf %241, %242 : vector<8x128xf32>
    %244 = arith.mulf %235, %211 : vector<8x128xf32>
    %245 = arith.mulf %229, %237 : vector<8x128xf32>
    %246 = arith.addf %244, %245 : vector<8x128xf32>
    %247 = math.tanh %246 : vector<8x128xf32>
    %248 = arith.mulf %243, %247 : vector<8x128xf32>
    %c7 = arith.constant 7 : index
    %c0_61 = arith.constant 0 : index
    %c0_62 = arith.constant 0 : index
    %249 = vector.load %arg1[%c7, %c0_61, %c0_62] : memref<8x8x1xf32, #tpu.memory_space<vmem>>, vector<1x8x1xf32>
    %250 = vector.shape_cast %249 : vector<1x8x1xf32> to vector<8x1xf32>
    %251 = vector.broadcast %250 : vector<8x1xf32> to vector<8x512xf32>
    %252 = vector.broadcast %0 : vector<1x512xf32> to vector<8x512xf32>
    %253 = arith.mulf %251, %252 : vector<8x512xf32>
    %254 = vector.broadcast %1 : vector<1x512xf32> to vector<8x512xf32>
    %255 = arith.addf %253, %254 : vector<8x512xf32>
    %c0_63 = arith.constant 0 : index
    %c0_64 = arith.constant 0 : index
    %256 = vector.load %arg4[%c0_63, %c0_64] : memref<128x512xf32, #tpu.memory_space<vmem>>, vector<128x512xf32>
    %cst_65 = arith.constant dense<0.000000e+00> : vector<8x512xf32>
    %257 = tpu.matmul %248, %256, %cst_65 {dimension_numbers = #tpu.dot_dimension_numbers<[1], [0], [0], [1], [0, 0, 1, 1], [], []>} : vector<8x128xf32>, vector<128x512xf32>, vector<8x512xf32> -> vector<8x512xf32>
    %258 = arith.addf %255, %257 : vector<8x512xf32>
    %259 = vector.extract_strided_slice %258 {offsets = [0, 0], sizes = [8, 128], strides = [1, 1]} : vector<8x512xf32> to vector<8x128xf32>
    %260 = arith.negf %259 : vector<8x128xf32>
    %261 = math.exp %260 : vector<8x128xf32>
    %cst_66 = arith.constant 1.000000e+00 : f32
    %262 = vector.broadcast %cst_66 : f32 to vector<8x128xf32>
    %263 = arith.addf %262, %261 : vector<8x128xf32>
    %264 = arith.divf %262, %263 : vector<8x128xf32>
    %265 = vector.extract_strided_slice %258 {offsets = [0, 128], sizes = [8, 128], strides = [1, 1]} : vector<8x512xf32> to vector<8x128xf32>
    %266 = arith.negf %265 : vector<8x128xf32>
    %267 = math.exp %266 : vector<8x128xf32>
    %cst_67 = arith.constant 1.000000e+00 : f32
    %268 = vector.broadcast %cst_67 : f32 to vector<8x128xf32>
    %269 = arith.addf %268, %267 : vector<8x128xf32>
    %270 = arith.divf %268, %269 : vector<8x128xf32>
    %271 = vector.extract_strided_slice %258 {offsets = [0, 256], sizes = [8, 128], strides = [1, 1]} : vector<8x512xf32> to vector<8x128xf32>
    %272 = math.tanh %271 : vector<8x128xf32>
    %273 = vector.extract_strided_slice %258 {offsets = [0, 384], sizes = [8, 128], strides = [1, 1]} : vector<8x512xf32> to vector<8x128xf32>
    %274 = arith.negf %273 : vector<8x128xf32>
    %275 = math.exp %274 : vector<8x128xf32>
    %cst_68 = arith.constant 1.000000e+00 : f32
    %276 = vector.broadcast %cst_68 : f32 to vector<8x128xf32>
    %277 = arith.addf %276, %275 : vector<8x128xf32>
    %278 = arith.divf %276, %277 : vector<8x128xf32>
    %279 = arith.mulf %270, %246 : vector<8x128xf32>
    %280 = arith.mulf %264, %272 : vector<8x128xf32>
    %281 = arith.addf %279, %280 : vector<8x128xf32>
    %282 = math.tanh %281 : vector<8x128xf32>
    %283 = arith.mulf %278, %282 : vector<8x128xf32>
    %c0_69 = arith.constant 0 : index
    %c0_70 = arith.constant 0 : index
    %284 = vector.load %arg5[%c0_69, %c0_70] : memref<1x128xf32, #tpu.memory_space<vmem>>, vector<1x128xf32>
    %285 = vector.broadcast %284 : vector<1x128xf32> to vector<8x128xf32>
    %286 = arith.mulf %283, %285 : vector<8x128xf32>
    %cst_71 = arith.constant dense<0.000000e+00> : vector<8xf32>
    %287 = vector.multi_reduction <add>, %286, %cst_71 [1] : vector<8x128xf32> to vector<8xf32>
    %288 = vector.shape_cast %287 : vector<8xf32> to vector<8x1xf32>
    %c0_72 = arith.constant 0 : index
    %c0_73 = arith.constant 0 : index
    %289 = memref.load %arg6[%c0_72, %c0_73] : memref<1x1xf32, #tpu.memory_space<smem>>
    %290 = vector.broadcast %289 : f32 to vector<8x1xf32>
    %291 = arith.addf %288, %290 : vector<8x1xf32>
    %c0_74 = arith.constant 0 : index
    %c0_75 = arith.constant 0 : index
    %292 = vector.load %arg7[%c0_74, %c0_75] : memref<8x1xf32, #tpu.memory_space<vmem>>, vector<8x1xf32>
    tpu.vector_store %arg7[%c0_74, %c0_75], %291 {strides = array<i32>} : memref<8x1xf32, #tpu.memory_space<vmem>>, vector<8x1xf32>,
    return
  }
  func.func @transform_0(%arg0: i32) -> (i32, i32, i32) {
    %c0_i32 = arith.constant 0 : i32
    %c0_i32_0 = arith.constant 0 : i32
    %c0_i32_1 = arith.constant 0 : i32
    return %c0_i32, %arg0, %c0_i32_0 : i32, i32, i32
  }
  func.func @transform_1(%arg0: i32) -> (i32, i32) {
    %c0_i32 = arith.constant 0 : i32
    %c0_i32_0 = arith.constant 0 : i32
    %c0_i32_1 = arith.constant 0 : i32
    return %c0_i32, %c0_i32_0 : i32, i32
  }
  func.func @transform_2(%arg0: i32) -> (i32, i32) {
    %c0_i32 = arith.constant 0 : i32
    %c0_i32_0 = arith.constant 0 : i32
    %c0_i32_1 = arith.constant 0 : i32
    return %c0_i32, %c0_i32_0 : i32, i32
  }
  func.func @transform_3(%arg0: i32) -> (i32, i32) {
    %c0_i32 = arith.constant 0 : i32
    %c0_i32_0 = arith.constant 0 : i32
    %c0_i32_1 = arith.constant 0 : i32
    return %c0_i32, %c0_i32_0 : i32, i32
  }
  func.func @transform_4(%arg0: i32) -> (i32, i32) {
    %c0_i32 = arith.constant 0 : i32
    %c0_i32_0 = arith.constant 0 : i32
    %c0_i32_1 = arith.constant 0 : i32
    return %c0_i32, %c0_i32_0 : i32, i32
  }
  func.func @transform_5(%arg0: i32) -> (i32, i32) {
    %c0_i32 = arith.constant 0 : i32
    %c0_i32_0 = arith.constant 0 : i32
    %c0_i32_1 = arith.constant 0 : i32
    return %c0_i32, %c0_i32_0 : i32, i32
  }
  func.func @transform_6(%arg0: i32) -> (i32, i32) {
    %c0_i32 = arith.constant 0 : i32
    %c0_i32_0 = arith.constant 0 : i32
    return %arg0, %c0_i32 : i32, i32
  }
}

</mosaic_0001>

<bundles_post_ra>
// kernel: tpu_custom_call.1
= control target key start
LH: loop header
LB: loop body
LE: loop exit
PB: predicated region body
PF: predicated region fallthrough
CT: control target
= control target key end

     0   :  { %12 = vsyncpa [#allocation4], 0  ;;  %s2348_s21 = smov [#allocation3]   ;;  %s2881_s0 = inlined_call_operand.vmem [shape: f32[8,8,1], index: 0, kind: input, shape index: {}]   ;;  %s2882_s1 = inlined_call_operand.vmem [shape: f32[1,512], index: 1, kind: input, shape index: {}]   ;;  %s2883_s2 = inlined_call_operand.vmem [shape: f32[1,512], index: 2, kind: input, shape index: {}]   ;;  %s2884_s3 = inlined_call_operand.hbm [shape: f32[128,512], index: 3, kind: input, shape index: {}]   ;;  %s2885_s4 = inlined_call_operand.vmem [shape: f32[1,128], index: 4, kind: input, shape index: {}]   ;;  %s2886_s5 = inlined_call_operand.<no memory space> [shape: f32[1,1], index: 5, kind: input, shape index: {}]   ;;  %s2887_s6 = inlined_call_operand.vmem [shape: f32[8,1], index: 6, kind: output, shape index: {}]  }
   0x1   :  { %s24_s22 = sshll.u32 %s2348_s21, 4  ;;  %s2324_s25 = scalar_lea.hbm %s2884_s3, 8192  ;;  %s25_s22 = int_to_ptr.vmem [resolvable:$true] %s24_s22 }
   0x2   :  { %p2325_p0 = scmp.ne.s32.totalorder %s2884_s3, %s2324_s25  ;;  %p2328_p1 = scmp.lt.u32.totalorder %s2324_s25, %s2884_s3 }
   0x4   :  { %p2330_p2 = pnand %p2328_p1, %p2325_p0 }
   0x6   :  { %2333 = shalt.err (!%p2330_p2)
}
   0x7   :  { %s2334_s30 = scalar_lea.vmem %s25_s22, 8192  ;;  %p2339_p4 = scmp.lt.s32.totalorder %s25_s22, %s25_s22 }
   0x8   :  { %p2335_p3 = scmp.ne.s32.totalorder %s25_s22, %s2334_s30  ;;  %p2340_p5 = scmp.lt.s32.totalorder %s2334_s30, %s2334_s30 }
   0xa   :  { %p2341_p6 = por %p2340_p5, %p2339_p4 }
   0xc   :  { %p2342_p7 = pnand %p2341_p6, %p2335_p3 }
   0xe   :  { %2345 = shalt.err (!%p2342_p7)
}
   0xf   :  { %s2349_s7 = smov 512   ;;  %s2350_s8 = smov 32  }
  0x10   :  { %30 = dma.hbm_to_vmem [thread:$0]  %s2884_s3, 8192, %s25_s22, [#allocation4], %s2349_s7, %s2349_s7, %s2350_s8  }
  0x11   :  { %2346 = dma.done.wait [#allocation4], 8192  }
  0x12   :  { %2347 = vsyncadd [#allocation4], 4294959104  ;;  %v2351_v0 = vmov 0.0   ;;  %v2352_v1 = vmov 0   ;;  %v97_v2 = vld [vmem:[#allocation3 + $0x8] sm:$0xff]  ;;  %v99_v4 = vld [vmem:[#allocation3 + $0x18] sm:$0xff] }
  0x13   :  { %224 = vmatprep.mubr.f32.mxu0 %v2351_v0  ;;  %295 = vmatprep.mubr.f32.mxu1 %v2351_v0  ;;  %v101_v3 = vld [vmem:[#allocation3 + $0x28] sm:$0xff]  ;;  %v103_v6 = vld [vmem:[#allocation3 + $0x38] sm:$0xff]  ;;  %v96_v7 = vld [vmem:[#allocation3] sm:$0xff]  ;;  %vm1638_vm0 = vcmask 7168  }
  0x14   :  { %2194 = vset.pattern.permute.xlu0 %v2352_v1  ;;  %2195 = vset.pattern.permute.xlu1 %v2352_v1  ;;  %v2402_v5 = vpack.c.bf16 %v101_v3, %v97_v2  ;;  %v100_v8 = vld [vmem:[#allocation3 + $0x20] sm:$0xff]  ;;  %v2404_v9 = vpack.c.bf16 %v103_v6, %v99_v4  ;;  %v98_v11 = vld [vmem:[#allocation3 + $0x10] sm:$0xff]  ;;  %v105_v13 = vld [vmem:[#allocation3 + $0x48] sm:$0xff] }
  0x15   :  { %v2406_v10 = vpack.c.bf16 %v100_v8, %v96_v7  ;;  %v102_v12 = vld [vmem:[#allocation3 + $0x30] sm:$0xff]  ;;  %v109_v15 = vld [vmem:[#allocation3 + $0x68] sm:$0xff]  ;;  %v107_v16 = vld [vmem:[#allocation3 + $0x58] sm:$0xff] }
  0x16   :  { %1678 = vmatprep.subr.bf16.mxu0 %v2402_v5  ;;  %v2409_v14 = vpack.c.bf16 %v102_v12, %v98_v11  ;;  %v111_v17 = vld [vmem:[#allocation3 + $0x78] sm:$0xff]  ;;  %1710 = vmatprep.subr.bf16.mxu1 %v2404_v9  ;;  %v2413_v18 = vpack.c.bf16 %v109_v15, %v105_v13  ;;  %v104_v20 = vld [vmem:[#allocation3 + $0x40] sm:$0xff]  ;;  %v106_v22 = vld [vmem:[#allocation3 + $0x50] sm:$0xff] }
  0x17   :  { %1680 = vmatpush1.bf16.msra.mxu0 %v2406_v10  ;;  %v2415_v19 = vpack.c.bf16 %v111_v17, %v107_v16  ;;  %v108_v21 = vld [vmem:[#allocation3 + $0x60] sm:$0xff]  ;;  %v110_v24 = vld [vmem:[#allocation3 + $0x70] sm:$0xff]  ;;  %v113_v25 = vld [vmem:[#allocation3 + $0x88] sm:$0xff] }
  0x18   :  { %1712 = vmatpush1.bf16.msra.mxu1 %v2409_v14  ;;  %v2418_v23 = vpack.c.bf16 %v108_v21, %v104_v20  ;;  %v117_v26 = vld [vmem:[#allocation3 + $0xa8] sm:$0xff]  ;;  %1682 = vmatprep.subr.bf16.mxu0 %v2413_v18  ;;  %v2422_v27 = vpack.c.bf16 %v110_v24, %v106_v22  ;;  %v115_v29 = vld [vmem:[#allocation3 + $0x98] sm:$0xff]  ;;  %v112_v31 = vld [vmem:[#allocation3 + $0x80] sm:$0xff] }
  0x19   :  { %1714 = vmatprep.subr.bf16.mxu1 %v2415_v19  ;;  %v2424_v28 = vpack.c.bf16 %v117_v26, %v113_v25  ;;  %v119_v30 = vld [vmem:[#allocation3 + $0xb8] sm:$0xff]  ;;  %v116_v33 = vld [vmem:[#allocation3 + $0xa0] sm:$0xff]  ;;  %v114_v34 = vld [vmem:[#allocation3 + $0x90] sm:$0xff] }
  0x1a   :  { %v2426_v32 = vpack.c.bf16 %v119_v30, %v115_v29  ;;  %v118_v35 = vld [vmem:[#allocation3 + $0xb0] sm:$0xff]  ;;  %v2429_v36 = vpack.c.bf16 %v116_v33, %v112_v31  ;;  %v121_v37 = vld [vmem:[#allocation3 + $0xc8] sm:$0xff]  ;;  %v123_v39 = vld [vmem:[#allocation3 + $0xd8] sm:$0xff] }
  0x1b   :  { %1684 = vmatpush1.bf16.msra.mxu0 %v2418_v23  ;;  %v125_v38 = vld [vmem:[#allocation3 + $0xe8] sm:$0xff]  ;;  %v2433_v40 = vpack.c.bf16 %v118_v35, %v114_v34  ;;  %v127_v42 = vld [vmem:[#allocation3 + $0xf8] sm:$0xff]  ;;  %v120_v43 = vld [vmem:[#allocation3 + $0xc0] sm:$0xff] }
  0x1c   :  { %1716 = vmatpush1.bf16.msra.mxu1 %v2422_v27  ;;  %1686 = vmatprep.subr.bf16.mxu0 %v2424_v28  ;;  %v2435_v41 = vpack.c.bf16 %v125_v38, %v121_v37  ;;  %v124_v44 = vld [vmem:[#allocation3 + $0xe0] sm:$0xff]  ;;  %v2438_v45 = vpack.c.bf16 %v127_v42, %v123_v39  ;;  %v122_v46 = vld [vmem:[#allocation3 + $0xd0] sm:$0xff]  ;;  %v129_v48 = vld [vmem:[#allocation3 + $0x108] sm:$0xff] }
  0x1d   :  { %1718 = vmatprep.subr.bf16.mxu1 %v2426_v32  ;;  %v126_v47 = vld [vmem:[#allocation3 + $0xf0] sm:$0xff]  ;;  %v133_v49 = vld [vmem:[#allocation3 + $0x128] sm:$0xff]  ;;  %v131_v50 = vld [vmem:[#allocation3 + $0x118] sm:$0xff]  ;;  %v2441_v52 = vpack.c.bf16 %v124_v44, %v120_v43 }
  0x1e   :  { %v135_v51 = vld [vmem:[#allocation3 + $0x138] sm:$0xff]  ;;  %v2445_v53 = vpack.c.bf16 %v126_v47, %v122_v46  ;;  %v2447_v54 = vpack.c.bf16 %v133_v49, %v129_v48  ;;  %v128_v55 = vld [vmem:[#allocation3 + $0x100] sm:$0xff]  ;;  %v130_v57 = vld [vmem:[#allocation3 + $0x110] sm:$0xff] }
  0x1f   :  { %1688 = vmatpush1.bf16.msra.mxu0 %v2429_v36  ;;  %v132_v56 = vld [vmem:[#allocation3 + $0x120] sm:$0xff]  ;;  %v2450_v58 = vpack.c.bf16 %v135_v51, %v131_v50  ;;  %v134_v59 = vld [vmem:[#allocation3 + $0x130] sm:$0xff]  ;;  %v137_v60 = vld [vmem:[#allocation3 + $0x148] sm:$0xff] }
  0x20   :  { %1720 = vmatpush1.bf16.msra.mxu1 %v2433_v40  ;;  %1690 = vmatprep.subr.bf16.mxu0 %v2435_v41  ;;  %v141_v61 = vld [vmem:[#allocation3 + $0x168] sm:$0xff]  ;;  %v139_v62 = vld [vmem:[#allocation3 + $0x158] sm:$0xff]  ;;  %v2453_v1 = vpack.c.bf16 %v132_v56, %v128_v55  ;;  %v2457_v2 = vpack.c.bf16 %v134_v59, %v130_v57  ;;  %v136_v4 = vld [vmem:[#allocation3 + $0x140] sm:$0xff]  ;;  %v47_v56 = vlaneseq }
  0x21   :  { %1722 = vmatprep.subr.bf16.mxu1 %v2438_v45  ;;  %v143_v63 = vld [vmem:[#allocation3 + $0x178] sm:$0xff]  ;;  %v2459_v3 = vpack.c.bf16 %v141_v61, %v137_v60  ;;  %v140_v6 = vld [vmem:[#allocation3 + $0x160] sm:$0xff]  ;;  %v138_v7 = vld [vmem:[#allocation3 + $0x150] sm:$0xff] }
  0x22   :  { %v2462_v8 = vpack.c.bf16 %v143_v63, %v139_v62  ;;  %v142_v11 = vld [vmem:[#allocation3 + $0x170] sm:$0xff]  ;;  %v145_v12 = vld [vmem:[#allocation3 + $0x188] sm:$0xff]  ;;  %v147_v15 = vld [vmem:[#allocation3 + $0x198] sm:$0xff]  ;;  %v2465_v17 = vpack.c.bf16 %v140_v6, %v136_v4  ;;  %v48_v57 = vshrl.u32 %v47_v56, 7 }
  0x23   :  { %1692 = vmatpush1.bf16.msra.mxu0 %v2441_v52  ;;  %v149_v13 = vld [vmem:[#allocation3 + $0x1a8] sm:$0xff]  ;;  %v151_v16 = vld [vmem:[#allocation3 + $0x1b8] sm:$0xff]  ;;  %v144_v20 = vld [vmem:[#allocation3 + $0x180] sm:$0xff]  ;;  %v2469_v21 = vpack.c.bf16 %v142_v11, %v138_v7 }
  0x24   :  { %1724 = vmatpush1.bf16.msra.mxu1 %v2445_v53  ;;  %1694 = vmatprep.subr.bf16.mxu0 %v2447_v54  ;;  %v2471_v22 = vpack.c.bf16 %v149_v13, %v145_v12  ;;  %v148_v24 = vld [vmem:[#allocation3 + $0x1a0] sm:$0xff]  ;;  %v146_v25 = vld [vmem:[#allocation3 + $0x190] sm:$0xff]  ;;  %v2477_v29 = vpack.c.bf16 %v151_v16, %v147_v15  ;;  %v153_v31 = vld [vmem:[#allocation3 + $0x1c8] sm:$0xff]  ;;  %v49_v59 = vsub.s32 0, %v48_v57  ;;  %v53_v61 = vsub.s32 1, %v48_v57 }
  0x25   :  { %1726 = vmatprep.subr.bf16.mxu1 %v2450_v58  ;;  %v40_v26 = vld [vmem:[%s2881_s0] sm:$0xff]  ;;  %v150_v30 = vld [vmem:[#allocation3 + $0x1b0] sm:$0xff]  ;;  %v157_v33 = vld [vmem:[#allocation3 + $0x1e8] sm:$0xff]  ;;  %v2483_v38 = vpack.c.bf16 %v148_v24, %v144_v20  ;;  %v61_v7 = vsub.s32 3, %v48_v57  ;;  %v57_v24 = vsub.s32 2, %v48_v57 }
  0x26   :  { %43 = vperm.xlu0 %2194, %v40_v26   ;;  %v155_v34 = vld [vmem:[#allocation3 + $0x1d8] sm:$0xff]  ;;  %v1648_v37 = vld [vmem:[%s2881_s0 + $0x8] sm:$0xff]  ;;  %v2487_v39 = vpack.c.bf16 %v150_v30, %v146_v25  ;;  %v2489_v42 = vpack.c.bf16 %v157_v33, %v153_v31  ;;  %v152_v43 = vld [vmem:[#allocation3 + $0x1c0] sm:$0xff] }
  0x27   :  { %1696 = vmatpush1.bf16.msra.mxu0 %v2453_v1  ;;  %v159_v35 = vld [vmem:[#allocation3 + $0x1f8] sm:$0xff]  ;;  %v156_v44 = vld [vmem:[#allocation3 + $0x1e0] sm:$0xff]  ;;  %v154_v47 = vld [vmem:[#allocation3 + $0x1d0] sm:$0xff] }
  0x28   :  { %1728 = vmatpush1.bf16.msra.mxu1 %v2457_v2  ;;  %1698 = vmatprep.subr.bf16.mxu0 %v2459_v3  ;;  %v2492_v46 = vpack.c.bf16 %v159_v35, %v155_v34  ;;  %v158_v48 = vld [vmem:[#allocation3 + $0x1f0] sm:$0xff]  ;;  %v1660_v49 = vld [vmem:[%s2881_s0 + $0x20] sm:$0xff]  ;;  %v2498_v50 = vpack.c.bf16 %v156_v44, %v152_v43 }
  0x29   :  { %1730 = vmatprep.subr.bf16.mxu1 %v2462_v8  ;;  %v2502_v51 = vpack.c.bf16 %v158_v48, %v154_v47  ;;  %v1668_v55 = vld [vmem:[%s2881_s0 + $0x30] sm:$0xff]  ;;  %v38_v60 = vld [vmem:[%s2882_s1] sm:$0xf] }
  0x2a   :  { %334 = vperm.xlu0 %2194, %v1648_v37   ;;  %v2551_v62 = vrot.slane %v38_v60, %v49_v59  ;;  %v39_v63 = vld [vmem:[%s2883_s2] sm:$0xf]  ;;  %v2556_v4 = vrot.slane %v38_v60, %v53_v61  ;;  %v2564_v16 = vrot.slane %v38_v60, %v61_v7  ;;  %v2571_v34 = vrot.slane %v38_v60, %v57_v24 }
  0x2b   :  { %1700 = vmatpush1.bf16.msra.mxu0 %v2465_v17  ;;  %v2559_v12 = vrot.slane %v39_v63, %v49_v59  ;;  %v2562_v15 = vrot.slane %v39_v63, %v53_v61  ;;  %v2569_v31 = vrot.slane %v39_v63, %v61_v7  ;;  %v2575_v56 = vrot.slane %v39_v63, %v57_v24 }
  0x2c   :  { %1732 = vmatpush1.bf16.msra.mxu1 %v2469_v21  ;;  %1702 = vmatprep.subr.bf16.mxu0 %v2471_v22 }
  0x2d   :  { %1734 = vmatprep.subr.bf16.mxu1 %v2477_v29 }
  0x2e   :  { %889 = vperm.xlu0 %2194, %v1660_v49  }
  0x2f   :  { %1704 = vmatpush1.bf16.msra.mxu0 %v2483_v38 }
  0x30   :  { %1736 = vmatpush1.bf16.msra.mxu1 %v2487_v39  ;;  %1706 = vmatprep.subr.bf16.mxu0 %v2489_v42 }
  0x31   :  { %1738 = vmatprep.subr.bf16.mxu1 %v2492_v46 }
  0x32   :  { %1259 = vperm.xlu0 %2194, %v1668_v55  }
  0x33   :  { %1708 = vmatpush1.bf16.msra.mxu0 %v2498_v50 }
  0x34   :  { %1740 = vmatpush1.bf16.msra.mxu1 %v2502_v51  ;;  %1742 = vmatprep.subr.bf16.mxu0 %v2402_v5 }
  0x35   :  { %1774 = vmatprep.subr.bf16.mxu1 %v2404_v9 }
  0x36   :  { %225 = vmatmul.mubr.f32.vlgmr.msra.gmra.mrb[0].mxu0 %v2351_v0 }
  0x37   :  { %296 = vmatmul.mubr.f32.vlgmr.msra.gmra.mrb[0].mxu1 %v2351_v0  ;;  %1744 = vmatpush1.bf16.msra.mxu0 %v2406_v10 }
  0x38   :  { %1776 = vmatpush1.bf16.msra.mxu1 %v2409_v14  ;;  %1746 = vmatprep.subr.bf16.mxu0 %v2413_v18 }
  0x39   :  { %1778 = vmatprep.subr.bf16.mxu1 %v2415_v19  ;;  %409 = vmatprep.mubr.f32.mxu0 %v2351_v0 }
  0x3a   :  { %480 = vmatprep.mubr.f32.mxu1 %v2351_v0 }
  0x3b   :  { %1748 = vmatpush1.bf16.msra.mxu0 %v2418_v23 }
  0x3c   :  { %1780 = vmatpush1.bf16.msra.mxu1 %v2422_v27  ;;  %1750 = vmatprep.subr.bf16.mxu0 %v2424_v28 }
  0x3d   :  { %1782 = vmatprep.subr.bf16.mxu1 %v2426_v32 }
  0x3f   :  { %1752 = vmatpush1.bf16.msra.mxu0 %v2429_v36 }
  0x40   :  { %1784 = vmatpush1.bf16.msra.mxu1 %v2433_v40  ;;  %1754 = vmatprep.subr.bf16.mxu0 %v2435_v41 }
  0x41   :  { %1786 = vmatprep.subr.bf16.mxu1 %v2438_v45 }
  0x43   :  { %1756 = vmatpush1.bf16.msra.mxu0 %v2441_v52 }
  0x44   :  { %1788 = vmatpush1.bf16.msra.mxu1 %v2445_v53  ;;  %1758 = vmatprep.subr.bf16.mxu0 %v2447_v54 }
  0x45   :  { %1790 = vmatprep.subr.bf16.mxu1 %v2450_v58 }
  0x47   :  { %1760 = vmatpush1.bf16.msra.mxu0 %v2453_v1 }
  0x48   :  { %1792 = vmatpush1.bf16.msra.mxu1 %v2457_v2  ;;  %1762 = vmatprep.subr.bf16.mxu0 %v2459_v3 }
  0x49   :  { %1794 = vmatprep.subr.bf16.mxu1 %v2462_v8 }
  0x4b   :  { %1764 = vmatpush1.bf16.msra.mxu0 %v2465_v17 }
  0x4c   :  { %1796 = vmatpush1.bf16.msra.mxu1 %v2469_v21  ;;  %1766 = vmatprep.subr.bf16.mxu0 %v2471_v22 }
  0x4d   :  { %1798 = vmatprep.subr.bf16.mxu1 %v2477_v29 }
  0x4f   :  { %1768 = vmatpush1.bf16.msra.mxu0 %v2483_v38 }
  0x50   :  { %1800 = vmatpush1.bf16.msra.mxu1 %v2487_v39  ;;  %1770 = vmatprep.subr.bf16.mxu0 %v2489_v42 }
  0x51   :  { %1802 = vmatprep.subr.bf16.mxu1 %v2492_v46 }
  0x53   :  { %1772 = vmatpush1.bf16.msra.mxu0 %v2498_v50 }
  0x54   :  { %1804 = vmatpush1.bf16.msra.mxu1 %v2502_v51  ;;  %1806 = vmatprep.subr.bf16.mxu0 %v2402_v5 }
  0x55   :  { %1838 = vmatprep.subr.bf16.mxu1 %v2404_v9 }
  0xa5   :  { %v44_v6 = vpop.permute.xlu0 %43 }
  0xa6   :  { %v67_v11 = vmul.f32 %v2551_v62, %v44_v6  ;;  %v68_v13 = vmul.f32 %v2556_v4, %v44_v6  ;;  %v70_v30 = vmul.f32 %v2564_v16, %v44_v6  ;;  %v69_v55 = vmul.f32 %v2571_v34, %v44_v6 }
  0xa8   :  { %v92_v20 = vadd.f32 %v2559_v12, %v67_v11  ;;  %v93_v25 = vadd.f32 %v2562_v15, %v68_v13  ;;  %v95_v49 = vadd.f32 %v2569_v31, %v70_v30  ;;  %v94_v59 = vadd.f32 %v2575_v56, %v69_v55  ;;  %v1672_v55 = vld [vmem:[%s2881_s0 + $0x38] sm:$0xff] }
 0x109   :  { %v226_v26 = vpop.f32.mrb[0].mxu0 }
 0x10a   :  { %v302_v33 = vadd.f32 %v226_v26, %v92_v20  ;;  %v297_v35 = vpop.f32.mrb[0].mxu1  ;;  %v228_v37 = vpop.f32.mrb[1].mxu0 }
 0x10b   :  { %v303_v43 = vadd.f32 %v228_v37, %v93_v25  ;;  %v299_v44 = vpop.f32.mrb[1].mxu1  ;;  %v304_v60 = vadd.f32 %v297_v35, %v94_v59 }
 0x10c   :  { %v1645_v47 = vmul.f32 -1.442695, %v302_v33  ;;  %v305_v57 = vadd.f32 %v299_v44, %v95_v49  ;;  %v1664_v49 = vld [vmem:[%s2881_s0 + $0x28] sm:$0xff] }
 0x10d   :  { %v1646_v48 = vmul.f32 -1.442695, %v303_v43 }
 0x10e   :  { %2196 = vpow2.f32 %v1645_v47  ;;  %v1647_v61 = vmul.f32 -1.442695, %v305_v57  ;;  %v1652_v47 = vld [vmem:[%s2881_s0 + $0x10] sm:$0xff]  ;;  %v335_v57 = vpop.permute.xlu0 %334 }
 0x10f   :  { %2198 = vpow2.f32 %v1646_v48  ;;  %519 = vperm.xlu1 %2195, %v1652_v47   ;;  %v1656_v48 = vld [vmem:[%s2881_s0 + $0x18] sm:$0xff]  ;;  %v337_v59 = vmul.f32 %v335_v57, %v2551_v62 }
 0x110   :  { %2200 = vpow2.f32 %v1647_v61  ;;  %v338_v61 = vmul.f32 %v335_v57, %v2556_v4 }
 0x111   :  { %2202 = vtanh.f32 %v304_v60  ;;  %v341_v60 = vadd.f32 %v337_v59, %v2559_v12 }
 0x113   :  { %704 = vperm.xlu1 %2195, %v1656_v48  }
 0x117   :  { %1074 = vperm.xlu1 %2195, %v1664_v49  }
 0x118   :  { %v2197_v7 = vpop.eup %2196 }
 0x119   :  { %v2199_v11 = vpop.eup %2198  ;;  %v309_v13 = vadd.f32 1.0, %v2197_v7 }
 0x11a   :  { %v315_v20 = vadd.f32 1.0, %v2199_v11  ;;  %v2201_v25 = vpop.eup %2200 }
 0x11b   :  { %2204 = vrcp.f32 %v309_v13  ;;  %v2203_v26 = vpop.eup %2202  ;;  %v322_v24 = vadd.f32 1.0, %v2201_v25  ;;  %1444 = vperm.xlu1 %2195, %v1672_v55   ;;  %v342_v13 = vadd.f32 %v338_v61, %v2562_v15 }
 0x11c   :  { %2206 = vrcp.f32 %v315_v20 }
 0x11d   :  { %2208 = vrcp.f32 %v322_v24 }
 0x125   :  { %v2205_v30 = vpop.eup %2204 }
 0x126   :  { %v2207_v6 = vpop.eup %2206  ;;  %v326_v63 = vmul.f32 %v2205_v30, %v2203_v26 }
 0x127   :  { %v325_v33 = vmul.f32 0.0, %v2207_v6  ;;  %v2209_v35 = vpop.eup %2208  ;;  %v340_v6 = vmul.f32 %v335_v57, %v2564_v16 }
 0x129   :  { %v2578_v37 = vadd.f32 %v326_v63, %v325_v33  ;;  %v344_v33 = vadd.f32 %v340_v6, %v2569_v31 }
 0x12b   :  { %2210 = vtanh.f32 %v2578_v37 }
 0x135   :  { %v2211_v43 = vpop.eup %2210 }
 0x136   :  { %v329_v44 = vmul.f32 %v2211_v43, %v2209_v35  ;;  %v339_v35 = vmul.f32 %v335_v57, %v2571_v34 }
 0x138   :  { %410 = vmatmul.mubr.f32.vlgmr.msra.gmra.mrb[2].mxu0 %v329_v44  ;;  %481 = vmatmul.mubr.f32.vlgmr.msra.gmra.mrb[2].mxu1 %v329_v44  ;;  %v343_v44 = vadd.f32 %v339_v35, %v2575_v56 }
 0x139   :  { %1808 = vmatpush1.bf16.msra.mxu0 %v2406_v10  ;;  %1840 = vmatpush1.bf16.msra.mxu1 %v2409_v14 }
 0x13a   :  { %1810 = vmatprep.subr.bf16.mxu0 %v2413_v18  ;;  %1842 = vmatprep.subr.bf16.mxu1 %v2415_v19 }
 0x13b   :  { %594 = vmatprep.mubr.f32.mxu0 %v2351_v0  ;;  %665 = vmatprep.mubr.f32.mxu1 %v2351_v0 }
 0x13d   :  { %1812 = vmatpush1.bf16.msra.mxu0 %v2418_v23  ;;  %1844 = vmatpush1.bf16.msra.mxu1 %v2422_v27 }
 0x13e   :  { %1814 = vmatprep.subr.bf16.mxu0 %v2424_v28  ;;  %1846 = vmatprep.subr.bf16.mxu1 %v2426_v32 }
 0x141   :  { %1816 = vmatpush1.bf16.msra.mxu0 %v2429_v36  ;;  %1848 = vmatpush1.bf16.msra.mxu1 %v2433_v40 }
 0x142   :  { %1818 = vmatprep.subr.bf16.mxu0 %v2435_v41  ;;  %1850 = vmatprep.subr.bf16.mxu1 %v2438_v45 }
 0x145   :  { %1820 = vmatpush1.bf16.msra.mxu0 %v2441_v52  ;;  %1852 = vmatpush1.bf16.msra.mxu1 %v2445_v53 }
 0x146   :  { %1822 = vmatprep.subr.bf16.mxu0 %v2447_v54  ;;  %1854 = vmatprep.subr.bf16.mxu1 %v2450_v58 }
 0x149   :  { %1824 = vmatpush1.bf16.msra.mxu0 %v2453_v1  ;;  %1856 = vmatpush1.bf16.msra.mxu1 %v2457_v2 }
 0x14a   :  { %1826 = vmatprep.subr.bf16.mxu0 %v2459_v3  ;;  %1858 = vmatprep.subr.bf16.mxu1 %v2462_v8 }
 0x14d   :  { %1828 = vmatpush1.bf16.msra.mxu0 %v2465_v17  ;;  %1860 = vmatpush1.bf16.msra.mxu1 %v2469_v21 }
 0x14e   :  { %1830 = vmatprep.subr.bf16.mxu0 %v2471_v22  ;;  %1862 = vmatprep.subr.bf16.mxu1 %v2477_v29 }
 0x151   :  { %1832 = vmatpush1.bf16.msra.mxu0 %v2483_v38  ;;  %1864 = vmatpush1.bf16.msra.mxu1 %v2487_v39 }
 0x152   :  { %1834 = vmatprep.subr.bf16.mxu0 %v2489_v42  ;;  %1866 = vmatprep.subr.bf16.mxu1 %v2492_v46 }
 0x155   :  { %1836 = vmatpush1.bf16.msra.mxu0 %v2498_v50  ;;  %1868 = vmatpush1.bf16.msra.mxu1 %v2502_v51 }
 0x156   :  { %1870 = vmatprep.subr.bf16.mxu0 %v2402_v5  ;;  %1902 = vmatprep.subr.bf16.mxu1 %v2404_v9 }
 0x20b   :  { %v411_v7 = vpop.f32.mrb[2].mxu0  ;;  %v482_v11 = vpop.f32.mrb[2].mxu1 }
 0x20c   :  { %v487_v20 = vadd.f32 %v411_v7, %v341_v60  ;;  %v413_v25 = vpop.f32.mrb[3].mxu0  ;;  %v484_v26 = vpop.f32.mrb[3].mxu1  ;;  %v489_v48 = vadd.f32 %v482_v11, %v343_v44 }
 0x20d   :  { %v488_v30 = vadd.f32 %v413_v25, %v342_v13  ;;  %v490_v43 = vadd.f32 %v484_v26, %v344_v33 }
 0x20e   :  { %v1649_v63 = vmul.f32 -1.442695, %v487_v20 }
 0x20f   :  { %v1650_v24 = vmul.f32 -1.442695, %v488_v30  ;;  %v1651_v47 = vmul.f32 -1.442695, %v490_v43 }
 0x210   :  { %2212 = vpow2.f32 %v1649_v63 }
 0x211   :  { %2214 = vpow2.f32 %v1650_v24 }
 0x212   :  { %2216 = vpow2.f32 %v1651_v47 }
 0x213   :  { %2218 = vtanh.f32 %v489_v48 }
 0x21a   :  { %v2213_v49 = vpop.eup %2212 }
 0x21b   :  { %v2215_v55 = vpop.eup %2214  ;;  %v494_v59 = vadd.f32 1.0, %v2213_v49 }
 0x21c   :  { %v500_v61 = vadd.f32 1.0, %v2215_v55  ;;  %v2217_v60 = vpop.eup %2216 }
 0x21d   :  { %2220 = vrcp.f32 %v494_v59  ;;  %v2219_v7 = vpop.eup %2218  ;;  %v507_v30 = vadd.f32 1.0, %v2217_v60 }
 0x21e   :  { %2222 = vrcp.f32 %v500_v61 }
 0x21f   :  { %2224 = vrcp.f32 %v507_v30 }
 0x227   :  { %v2221_v13 = vpop.eup %2220 }
 0x228   :  { %v2223_v20 = vpop.eup %2222  ;;  %v511_v25 = vmul.f32 %v2221_v13, %v2219_v7 }
 0x229   :  { %v510_v57 = vmul.f32 %v2223_v20, %v2578_v37  ;;  %v2225_v11 = vpop.eup %2224  ;;  %v520_v37 = vpop.permute.xlu1 %519 }
 0x22a   :  { %v522_v24 = vmul.f32 %v520_v37, %v2551_v62  ;;  %v523_v33 = vmul.f32 %v520_v37, %v2556_v4  ;;  %v525_v48 = vmul.f32 %v520_v37, %v2564_v16  ;;  %v524_v20 = vmul.f32 %v520_v37, %v2571_v34 }
 0x22b   :  { %v2636_v26 = vadd.f32 %v511_v25, %v510_v57 }
 0x22c   :  { %v526_v35 = vadd.f32 %v522_v24, %v2559_v12  ;;  %v527_v43 = vadd.f32 %v523_v33, %v2562_v15  ;;  %v529_v13 = vadd.f32 %v525_v48, %v2569_v31  ;;  %v528_v30 = vadd.f32 %v524_v20, %v2575_v56 }
 0x22d   :  { %2226 = vtanh.f32 %v2636_v26 }
 0x237   :  { %v2227_v6 = vpop.eup %2226 }
 0x238   :  { %v514_v63 = vmul.f32 %v2227_v6, %v2225_v11 }
 0x23a   :  { %595 = vmatmul.mubr.f32.vlgmr.msra.gmra.mrb[4].mxu0 %v514_v63  ;;  %666 = vmatmul.mubr.f32.vlgmr.msra.gmra.mrb[4].mxu1 %v514_v63 }
 0x23b   :  { %1872 = vmatpush1.bf16.msra.mxu0 %v2406_v10  ;;  %1904 = vmatpush1.bf16.msra.mxu1 %v2409_v14 }
 0x23c   :  { %1874 = vmatprep.subr.bf16.mxu0 %v2413_v18  ;;  %1906 = vmatprep.subr.bf16.mxu1 %v2415_v19 }
 0x23d   :  { %779 = vmatprep.mubr.f32.mxu0 %v2351_v0  ;;  %850 = vmatprep.mubr.f32.mxu1 %v2351_v0 }
 0x23f   :  { %1876 = vmatpush1.bf16.msra.mxu0 %v2418_v23  ;;  %1908 = vmatpush1.bf16.msra.mxu1 %v2422_v27 }
 0x240   :  { %1878 = vmatprep.subr.bf16.mxu0 %v2424_v28  ;;  %1910 = vmatprep.subr.bf16.mxu1 %v2426_v32 }
 0x243   :  { %1880 = vmatpush1.bf16.msra.mxu0 %v2429_v36  ;;  %1912 = vmatpush1.bf16.msra.mxu1 %v2433_v40 }
 0x244   :  { %1882 = vmatprep.subr.bf16.mxu0 %v2435_v41  ;;  %1914 = vmatprep.subr.bf16.mxu1 %v2438_v45 }
 0x247   :  { %1884 = vmatpush1.bf16.msra.mxu0 %v2441_v52  ;;  %1916 = vmatpush1.bf16.msra.mxu1 %v2445_v53 }
 0x248   :  { %1886 = vmatprep.subr.bf16.mxu0 %v2447_v54  ;;  %1918 = vmatprep.subr.bf16.mxu1 %v2450_v58 }
 0x24b   :  { %1888 = vmatpush1.bf16.msra.mxu0 %v2453_v1  ;;  %1920 = vmatpush1.bf16.msra.mxu1 %v2457_v2 }
 0x24c   :  { %1890 = vmatprep.subr.bf16.mxu0 %v2459_v3  ;;  %1922 = vmatprep.subr.bf16.mxu1 %v2462_v8 }
 0x24f   :  { %1892 = vmatpush1.bf16.msra.mxu0 %v2465_v17  ;;  %1924 = vmatpush1.bf16.msra.mxu1 %v2469_v21 }
 0x250   :  { %1894 = vmatprep.subr.bf16.mxu0 %v2471_v22  ;;  %1926 = vmatprep.subr.bf16.mxu1 %v2477_v29 }
 0x253   :  { %1896 = vmatpush1.bf16.msra.mxu0 %v2483_v38  ;;  %1928 = vmatpush1.bf16.msra.mxu1 %v2487_v39 }
 0x254   :  { %1898 = vmatprep.subr.bf16.mxu0 %v2489_v42  ;;  %1930 = vmatprep.subr.bf16.mxu1 %v2492_v46 }
 0x257   :  { %1900 = vmatpush1.bf16.msra.mxu0 %v2498_v50  ;;  %1932 = vmatpush1.bf16.msra.mxu1 %v2502_v51 }
 0x258   :  { %1934 = vmatprep.subr.bf16.mxu0 %v2402_v5  ;;  %1966 = vmatprep.subr.bf16.mxu1 %v2404_v9 }
 0x30d   :  { %v596_v44 = vpop.f32.mrb[4].mxu0  ;;  %v667_v47 = vpop.f32.mrb[4].mxu1 }
 0x30e   :  { %v672_v49 = vadd.f32 %v596_v44, %v526_v35  ;;  %v598_v55 = vpop.f32.mrb[5].mxu0  ;;  %v669_v59 = vpop.f32.mrb[5].mxu1  ;;  %v674_v11 = vadd.f32 %v667_v47, %v528_v30 }
 0x30f   :  { %v673_v61 = vadd.f32 %v598_v55, %v527_v43  ;;  %v675_v25 = vadd.f32 %v669_v59, %v529_v13 }
 0x310   :  { %v1653_v60 = vmul.f32 -1.442695, %v672_v49 }
 0x311   :  { %v1654_v7 = vmul.f32 -1.442695, %v673_v61  ;;  %v1655_v57 = vmul.f32 -1.442695, %v675_v25 }
 0x312   :  { %2228 = vpow2.f32 %v1653_v60 }
 0x313   :  { %2230 = vpow2.f32 %v1654_v7 }
 0x314   :  { %2232 = vpow2.f32 %v1655_v57 }
 0x315   :  { %2234 = vtanh.f32 %v674_v11 }
 0x31c   :  { %v2229_v6 = vpop.eup %2228 }
 0x31d   :  { %v2231_v63 = vpop.eup %2230  ;;  %v679_v24 = vadd.f32 1.0, %v2229_v6 }
 0x31e   :  { %v685_v33 = vadd.f32 1.0, %v2231_v63  ;;  %v2233_v35 = vpop.eup %2232 }
 0x31f   :  { %2236 = vrcp.f32 %v679_v24  ;;  %v2235_v43 = vpop.eup %2234  ;;  %v692_v37 = vadd.f32 1.0, %v2233_v35 }
 0x320   :  { %2238 = vrcp.f32 %v685_v33 }
 0x321   :  { %2240 = vrcp.f32 %v692_v37 }
 0x329   :  { %v2237_v44 = vpop.eup %2236 }
 0x32a   :  { %v2239_v48 = vpop.eup %2238  ;;  %v696_v49 = vmul.f32 %v2237_v44, %v2235_v43 }
 0x32b   :  { %v695_v55 = vmul.f32 %v2239_v48, %v2636_v26  ;;  %v2241_v47 = vpop.eup %2240  ;;  %v705_v26 = vpop.permute.xlu1 %704 }
 0x32c   :  { %v707_v7 = vmul.f32 %v705_v26, %v2551_v62  ;;  %v708_v13 = vmul.f32 %v705_v26, %v2556_v4  ;;  %v710_v33 = vmul.f32 %v705_v26, %v2564_v16  ;;  %v709_v48 = vmul.f32 %v705_v26, %v2571_v34 }
 0x32d   :  { %v2682_v59 = vadd.f32 %v696_v49, %v695_v55 }
 0x32e   :  { %v711_v20 = vadd.f32 %v707_v7, %v2559_v12  ;;  %v712_v57 = vadd.f32 %v708_v13, %v2562_v15  ;;  %v714_v44 = vadd.f32 %v710_v33, %v2569_v31  ;;  %v713_v37 = vadd.f32 %v709_v48, %v2575_v56 }
 0x32f   :  { %2242 = vtanh.f32 %v2682_v59 }
 0x339   :  { %v2243_v61 = vpop.eup %2242 }
 0x33a   :  { %v699_v60 = vmul.f32 %v2243_v61, %v2241_v47 }
 0x33c   :  { %780 = vmatmul.mubr.f32.vlgmr.msra.gmra.mrb[6].mxu0 %v699_v60  ;;  %851 = vmatmul.mubr.f32.vlgmr.msra.gmra.mrb[6].mxu1 %v699_v60 }
 0x33d   :  { %1936 = vmatpush1.bf16.msra.mxu0 %v2406_v10  ;;  %1968 = vmatpush1.bf16.msra.mxu1 %v2409_v14 }
 0x33e   :  { %1938 = vmatprep.subr.bf16.mxu0 %v2413_v18  ;;  %1970 = vmatprep.subr.bf16.mxu1 %v2415_v19 }
 0x33f   :  { %964 = vmatprep.mubr.f32.mxu0 %v2351_v0  ;;  %1035 = vmatprep.mubr.f32.mxu1 %v2351_v0 }
 0x341   :  { %1940 = vmatpush1.bf16.msra.mxu0 %v2418_v23  ;;  %1972 = vmatpush1.bf16.msra.mxu1 %v2422_v27 }
 0x342   :  { %1942 = vmatprep.subr.bf16.mxu0 %v2424_v28  ;;  %1974 = vmatprep.subr.bf16.mxu1 %v2426_v32 }
 0x345   :  { %1944 = vmatpush1.bf16.msra.mxu0 %v2429_v36  ;;  %1976 = vmatpush1.bf16.msra.mxu1 %v2433_v40 }
 0x346   :  { %1946 = vmatprep.subr.bf16.mxu0 %v2435_v41  ;;  %1978 = vmatprep.subr.bf16.mxu1 %v2438_v45 }
 0x349   :  { %1948 = vmatpush1.bf16.msra.mxu0 %v2441_v52  ;;  %1980 = vmatpush1.bf16.msra.mxu1 %v2445_v53 }
 0x34a   :  { %1950 = vmatprep.subr.bf16.mxu0 %v2447_v54  ;;  %1982 = vmatprep.subr.bf16.mxu1 %v2450_v58 }
 0x34d   :  { %1952 = vmatpush1.bf16.msra.mxu0 %v2453_v1  ;;  %1984 = vmatpush1.bf16.msra.mxu1 %v2457_v2 }
 0x34e   :  { %1954 = vmatprep.subr.bf16.mxu0 %v2459_v3  ;;  %1986 = vmatprep.subr.bf16.mxu1 %v2462_v8 }
 0x351   :  { %1956 = vmatpush1.bf16.msra.mxu0 %v2465_v17  ;;  %1988 = vmatpush1.bf16.msra.mxu1 %v2469_v21 }
 0x352   :  { %1958 = vmatprep.subr.bf16.mxu0 %v2471_v22  ;;  %1990 = vmatprep.subr.bf16.mxu1 %v2477_v29 }
 0x355   :  { %1960 = vmatpush1.bf16.msra.mxu0 %v2483_v38  ;;  %1992 = vmatpush1.bf16.msra.mxu1 %v2487_v39 }
 0x356   :  { %1962 = vmatprep.subr.bf16.mxu0 %v2489_v42  ;;  %1994 = vmatprep.subr.bf16.mxu1 %v2492_v46 }
 0x359   :  { %1964 = vmatpush1.bf16.msra.mxu0 %v2498_v50  ;;  %1996 = vmatpush1.bf16.msra.mxu1 %v2502_v51 }
 0x35a   :  { %1998 = vmatprep.subr.bf16.mxu0 %v2402_v5  ;;  %2030 = vmatprep.subr.bf16.mxu1 %v2404_v9 }
 0x40f   :  { %v781_v25 = vpop.f32.mrb[6].mxu0  ;;  %v852_v30 = vpop.f32.mrb[6].mxu1 }
 0x410   :  { %v857_v11 = vadd.f32 %v781_v25, %v711_v20  ;;  %v783_v6 = vpop.f32.mrb[7].mxu0  ;;  %v854_v63 = vpop.f32.mrb[7].mxu1  ;;  %v859_v47 = vadd.f32 %v852_v30, %v713_v37 }
 0x411   :  { %v858_v24 = vadd.f32 %v783_v6, %v712_v57  ;;  %v860_v49 = vadd.f32 %v854_v63, %v714_v44 }
 0x412   :  { %v1657_v35 = vmul.f32 -1.442695, %v857_v11 }
 0x413   :  { %v1658_v43 = vmul.f32 -1.442695, %v858_v24  ;;  %v1659_v55 = vmul.f32 -1.442695, %v860_v49 }
 0x414   :  { %2244 = vpow2.f32 %v1657_v35 }
 0x415   :  { %2246 = vpow2.f32 %v1658_v43 }
 0x416   :  { %2248 = vpow2.f32 %v1659_v55 }
 0x417   :  { %2250 = vtanh.f32 %v859_v47 }
 0x41e   :  { %v2245_v61 = vpop.eup %2244 }
 0x41f   :  { %v2247_v60 = vpop.eup %2246  ;;  %v864_v7 = vadd.f32 1.0, %v2245_v61 }
 0x420   :  { %v870_v13 = vadd.f32 1.0, %v2247_v60  ;;  %v2249_v20 = vpop.eup %2248 }
 0x421   :  { %2252 = vrcp.f32 %v864_v7  ;;  %v2251_v25 = vpop.eup %2250  ;;  %v877_v24 = vadd.f32 1.0, %v2249_v20 }
 0x422   :  { %2254 = vrcp.f32 %v870_v13 }
 0x423   :  { %2256 = vrcp.f32 %v877_v24 }
 0x42b   :  { %v2253_v57 = vpop.eup %2252 }
 0x42c   :  { %v2255_v11 = vpop.eup %2254  ;;  %v881_v6 = vmul.f32 %v2253_v57, %v2251_v25 }
 0x42d   :  { %v880_v26 = vmul.f32 %v2255_v11, %v2682_v59  ;;  %v2257_v30 = vpop.eup %2256  ;;  %v890_v59 = vpop.permute.xlu0 %889 }
 0x42e   :  { %v892_v43 = vmul.f32 %v890_v59, %v2551_v62  ;;  %v893_v44 = vmul.f32 %v890_v59, %v2556_v4  ;;  %v895_v13 = vmul.f32 %v890_v59, %v2564_v16  ;;  %v894_v11 = vmul.f32 %v890_v59, %v2571_v34 }
 0x42f   :  { %v2728_v63 = vadd.f32 %v881_v6, %v880_v26 }
 0x430   :  { %v896_v48 = vadd.f32 %v892_v43, %v2559_v12  ;;  %v897_v55 = vadd.f32 %v893_v44, %v2562_v15  ;;  %v899_v57 = vadd.f32 %v895_v13, %v2569_v31  ;;  %v898_v24 = vadd.f32 %v894_v11, %v2575_v56 }
 0x431   :  { %2258 = vtanh.f32 %v2728_v63 }
 0x43b   :  { %v2259_v33 = vpop.eup %2258 }
 0x43c   :  { %v884_v35 = vmul.f32 %v2259_v33, %v2257_v30 }
 0x43e   :  { %965 = vmatmul.mubr.f32.vlgmr.msra.gmra.mrb[8].mxu0 %v884_v35  ;;  %1036 = vmatmul.mubr.f32.vlgmr.msra.gmra.mrb[8].mxu1 %v884_v35 }
 0x43f   :  { %2000 = vmatpush1.bf16.msra.mxu0 %v2406_v10  ;;  %2032 = vmatpush1.bf16.msra.mxu1 %v2409_v14 }
 0x440   :  { %2002 = vmatprep.subr.bf16.mxu0 %v2413_v18  ;;  %2034 = vmatprep.subr.bf16.mxu1 %v2415_v19 }
 0x441   :  { %1149 = vmatprep.mubr.f32.mxu0 %v2351_v0  ;;  %1220 = vmatprep.mubr.f32.mxu1 %v2351_v0 }
 0x443   :  { %2004 = vmatpush1.bf16.msra.mxu0 %v2418_v23  ;;  %2036 = vmatpush1.bf16.msra.mxu1 %v2422_v27 }
 0x444   :  { %2006 = vmatprep.subr.bf16.mxu0 %v2424_v28  ;;  %2038 = vmatprep.subr.bf16.mxu1 %v2426_v32 }
 0x447   :  { %2008 = vmatpush1.bf16.msra.mxu0 %v2429_v36  ;;  %2040 = vmatpush1.bf16.msra.mxu1 %v2433_v40 }
 0x448   :  { %2010 = vmatprep.subr.bf16.mxu0 %v2435_v41  ;;  %2042 = vmatprep.subr.bf16.mxu1 %v2438_v45 }
 0x44b   :  { %2012 = vmatpush1.bf16.msra.mxu0 %v2441_v52  ;;  %2044 = vmatpush1.bf16.msra.mxu1 %v2445_v53 }
 0x44c   :  { %2014 = vmatprep.subr.bf16.mxu0 %v2447_v54  ;;  %2046 = vmatprep.subr.bf16.mxu1 %v2450_v58 }
 0x44f   :  { %2016 = vmatpush1.bf16.msra.mxu0 %v2453_v1  ;;  %2048 = vmatpush1.bf16.msra.mxu1 %v2457_v2 }
 0x450   :  { %2018 = vmatprep.subr.bf16.mxu0 %v2459_v3  ;;  %2050 = vmatprep.subr.bf16.mxu1 %v2462_v8 }
 0x453   :  { %2020 = vmatpush1.bf16.msra.mxu0 %v2465_v17  ;;  %2052 = vmatpush1.bf16.msra.mxu1 %v2469_v21 }
 0x454   :  { %2022 = vmatprep.subr.bf16.mxu0 %v2471_v22  ;;  %2054 = vmatprep.subr.bf16.mxu1 %v2477_v29 }
 0x457   :  { %2024 = vmatpush1.bf16.msra.mxu0 %v2483_v38  ;;  %2056 = vmatpush1.bf16.msra.mxu1 %v2487_v39 }
 0x458   :  { %2026 = vmatprep.subr.bf16.mxu0 %v2489_v42  ;;  %2058 = vmatprep.subr.bf16.mxu1 %v2492_v46 }
 0x45b   :  { %2028 = vmatpush1.bf16.msra.mxu0 %v2498_v50  ;;  %2060 = vmatpush1.bf16.msra.mxu1 %v2502_v51 }
 0x45c   :  { %2062 = vmatprep.subr.bf16.mxu0 %v2402_v5  ;;  %2094 = vmatprep.subr.bf16.mxu1 %v2404_v9 }
 0x511   :  { %v966_v49 = vpop.f32.mrb[8].mxu0  ;;  %v1037_v37 = vpop.f32.mrb[8].mxu1 }
 0x512   :  { %v1042_v47 = vadd.f32 %v966_v49, %v896_v48  ;;  %v968_v61 = vpop.f32.mrb[9].mxu0  ;;  %v1039_v60 = vpop.f32.mrb[9].mxu1  ;;  %v1044_v30 = vadd.f32 %v1037_v37, %v898_v24 }
 0x513   :  { %v1043_v7 = vadd.f32 %v968_v61, %v897_v55  ;;  %v1045_v6 = vadd.f32 %v1039_v60, %v899_v57 }
 0x514   :  { %v1661_v20 = vmul.f32 -1.442695, %v1042_v47 }
 0x515   :  { %v1662_v25 = vmul.f32 -1.442695, %v1043_v7  ;;  %v1663_v26 = vmul.f32 -1.442695, %v1045_v6 }
 0x516   :  { %2260 = vpow2.f32 %v1661_v20 }
 0x517   :  { %2262 = vpow2.f32 %v1662_v25 }
 0x518   :  { %2264 = vpow2.f32 %v1663_v26 }
 0x519   :  { %2266 = vtanh.f32 %v1044_v30 }
 0x520   :  { %v2261_v33 = vpop.eup %2260 }
 0x521   :  { %v2263_v35 = vpop.eup %2262  ;;  %v1049_v43 = vadd.f32 1.0, %v2261_v33 }
 0x522   :  { %v1055_v44 = vadd.f32 1.0, %v2263_v35  ;;  %v2265_v48 = vpop.eup %2264 }
 0x523   :  { %2268 = vrcp.f32 %v1049_v43  ;;  %v2267_v49 = vpop.eup %2266  ;;  %v1062_v7 = vadd.f32 1.0, %v2265_v48 }
 0x524   :  { %2270 = vrcp.f32 %v1055_v44 }
 0x525   :  { %2272 = vrcp.f32 %v1062_v7 }
 0x52d   :  { %v2269_v55 = vpop.eup %2268 }
 0x52e   :  { %v2271_v47 = vpop.eup %2270  ;;  %v1066_v61 = vmul.f32 %v2269_v55, %v2267_v49 }
 0x52f   :  { %v1065_v59 = vmul.f32 %v2271_v47, %v2728_v63  ;;  %v2273_v37 = vpop.eup %2272  ;;  %v1075_v63 = vpop.permute.xlu1 %1074 }
 0x530   :  { %v1077_v25 = vmul.f32 %v1075_v63, %v2551_v62  ;;  %v1078_v57 = vmul.f32 %v1075_v63, %v2556_v4  ;;  %v1080_v44 = vmul.f32 %v1075_v63, %v2564_v16  ;;  %v1079_v49 = vmul.f32 %v1075_v63, %v2571_v34 }
 0x531   :  { %v2774_v60 = vadd.f32 %v1066_v61, %v1065_v59 }
 0x532   :  { %v1081_v11 = vadd.f32 %v1077_v25, %v2559_v12  ;;  %v1082_v26 = vadd.f32 %v1078_v57, %v2562_v15  ;;  %v1083_v47 = vadd.f32 %v1079_v49, %v2575_v56 }
 0x533   :  { %2274 = vtanh.f32 %v2774_v60 }
 0x53d   :  { %v2275_v13 = vpop.eup %2274 }
 0x53e   :  { %v1069_v20 = vmul.f32 %v2275_v13, %v2273_v37 }
 0x540   :  { %1150 = vmatmul.mubr.f32.vlgmr.msra.gmra.mrb[10].mxu0 %v1069_v20  ;;  %1221 = vmatmul.mubr.f32.vlgmr.msra.gmra.mrb[10].mxu1 %v1069_v20 }
 0x541   :  { %2064 = vmatpush1.bf16.msra.mxu0 %v2406_v10  ;;  %2096 = vmatpush1.bf16.msra.mxu1 %v2409_v14 }
 0x542   :  { %2066 = vmatprep.subr.bf16.mxu0 %v2413_v18  ;;  %2098 = vmatprep.subr.bf16.mxu1 %v2415_v19 }
 0x543   :  { %1334 = vmatprep.mubr.f32.mxu0 %v2351_v0  ;;  %1405 = vmatprep.mubr.f32.mxu1 %v2351_v0 }
 0x545   :  { %2068 = vmatpush1.bf16.msra.mxu0 %v2418_v23  ;;  %2100 = vmatpush1.bf16.msra.mxu1 %v2422_v27 }
 0x546   :  { %2070 = vmatprep.subr.bf16.mxu0 %v2424_v28  ;;  %2102 = vmatprep.subr.bf16.mxu1 %v2426_v32 }
 0x549   :  { %2072 = vmatpush1.bf16.msra.mxu0 %v2429_v36  ;;  %2104 = vmatpush1.bf16.msra.mxu1 %v2433_v40 }
 0x54a   :  { %2074 = vmatprep.subr.bf16.mxu0 %v2435_v41  ;;  %2106 = vmatprep.subr.bf16.mxu1 %v2438_v45 }
 0x54d   :  { %2076 = vmatpush1.bf16.msra.mxu0 %v2441_v52  ;;  %2108 = vmatpush1.bf16.msra.mxu1 %v2445_v53 }
 0x54e   :  { %2078 = vmatprep.subr.bf16.mxu0 %v2447_v54  ;;  %2110 = vmatprep.subr.bf16.mxu1 %v2450_v58 }
 0x551   :  { %2080 = vmatpush1.bf16.msra.mxu0 %v2453_v1  ;;  %2112 = vmatpush1.bf16.msra.mxu1 %v2457_v2 }
 0x552   :  { %2082 = vmatprep.subr.bf16.mxu0 %v2459_v3  ;;  %2114 = vmatprep.subr.bf16.mxu1 %v2462_v8 }
 0x555   :  { %2084 = vmatpush1.bf16.msra.mxu0 %v2465_v17  ;;  %2116 = vmatpush1.bf16.msra.mxu1 %v2469_v21 }
 0x556   :  { %2086 = vmatprep.subr.bf16.mxu0 %v2471_v22  ;;  %2118 = vmatprep.subr.bf16.mxu1 %v2477_v29 }
 0x559   :  { %2088 = vmatpush1.bf16.msra.mxu0 %v2483_v38  ;;  %2120 = vmatpush1.bf16.msra.mxu1 %v2487_v39 }
 0x55a   :  { %2090 = vmatprep.subr.bf16.mxu0 %v2489_v42  ;;  %2122 = vmatprep.subr.bf16.mxu1 %v2492_v46 }
 0x55d   :  { %2092 = vmatpush1.bf16.msra.mxu0 %v2498_v50  ;;  %2124 = vmatpush1.bf16.msra.mxu1 %v2502_v51 }
 0x55e   :  { %2126 = vmatprep.subr.bf16.mxu0 %v2402_v5  ;;  %2158 = vmatprep.subr.bf16.mxu1 %v2404_v9  ;;  %v1084_v9 = vadd.f32 %v1080_v44, %v2569_v31 }
 0x613   :  { %v1151_v6 = vpop.f32.mrb[10].mxu0  ;;  %v1222_v24 = vpop.f32.mrb[10].mxu1 }
 0x614   :  { %v1227_v30 = vadd.f32 %v1151_v6, %v1081_v11  ;;  %v1153_v33 = vpop.f32.mrb[11].mxu0  ;;  %v1224_v35 = vpop.f32.mrb[11].mxu1  ;;  %v1229_v7 = vadd.f32 %v1222_v24, %v1083_v47 }
 0x615   :  { %v1228_v43 = vadd.f32 %v1153_v33, %v1082_v26  ;;  %v1230_v55 = vadd.f32 %v1224_v35, %v1084_v9  ;;  %v1445_v9 = vpop.permute.xlu1 %1444 }
 0x616   :  { %v1665_v5 = vmul.f32 -1.442695, %v1227_v30  ;;  %v1447_v49 = vmul.f32 %v1445_v9, %v2551_v62 }
 0x617   :  { %v1666_v48 = vmul.f32 -1.442695, %v1228_v43  ;;  %v1667_v61 = vmul.f32 -1.442695, %v1230_v55  ;;  %v1448_v55 = vmul.f32 %v1445_v9, %v2556_v4 }
 0x618   :  { %2276 = vpow2.f32 %v1665_v5  ;;  %v1451_v47 = vadd.f32 %v1447_v49, %v2559_v12 }
 0x619   :  { %2278 = vpow2.f32 %v1666_v48 }
 0x61a   :  { %2280 = vpow2.f32 %v1667_v61 }
 0x61b   :  { %2282 = vtanh.f32 %v1229_v7 }
 0x622   :  { %v2277_v59 = vpop.eup %2276 }
 0x623   :  { %v2279_v37 = vpop.eup %2278  ;;  %v1234_v13 = vadd.f32 1.0, %v2277_v59  ;;  %v1452_v59 = vadd.f32 %v1448_v55, %v2562_v15 }
 0x624   :  { %v1240_v20 = vadd.f32 1.0, %v2279_v37  ;;  %v2281_v25 = vpop.eup %2280 }
 0x625   :  { %2284 = vrcp.f32 %v1234_v13  ;;  %v2283_v57 = vpop.eup %2282  ;;  %v1247_v30 = vadd.f32 1.0, %v2281_v25  ;;  %v1450_v25 = vmul.f32 %v1445_v9, %v2564_v16 }
 0x626   :  { %2286 = vrcp.f32 %v1240_v20 }
 0x627   :  { %2288 = vrcp.f32 %v1247_v30 }
 0x62f   :  { %v2285_v11 = vpop.eup %2284 }
 0x630   :  { %v2287_v6 = vpop.eup %2286  ;;  %v1251_v26 = vmul.f32 %v2285_v11, %v2283_v57 }
 0x631   :  { %v1250_v63 = vmul.f32 %v2287_v6, %v2774_v60  ;;  %v2289_v24 = vpop.eup %2288 }
 0x633   :  { %v2820_v33 = vadd.f32 %v1251_v26, %v1250_v63 }
 0x635   :  { %2290 = vtanh.f32 %v2820_v33 }
 0x63f   :  { %v2291_v35 = vpop.eup %2290 }
 0x640   :  { %v1254_v43 = vmul.f32 %v2291_v35, %v2289_v24 }
 0x642   :  { %1335 = vmatmul.mubr.f32.vlgmr.msra.gmra.mrb[12].mxu0 %v1254_v43  ;;  %1406 = vmatmul.mubr.f32.vlgmr.msra.gmra.mrb[12].mxu1 %v1254_v43 }
 0x643   :  { %2128 = vmatpush1.bf16.msra.mxu0 %v2406_v10  ;;  %2160 = vmatpush1.bf16.msra.mxu1 %v2409_v14 }
 0x644   :  { %2130 = vmatprep.subr.bf16.mxu0 %v2413_v18  ;;  %2162 = vmatprep.subr.bf16.mxu1 %v2415_v19 }
 0x645   :  { %1519 = vmatprep.mubr.f32.mxu0 %v2351_v0  ;;  %1590 = vmatprep.mubr.f32.mxu1 %v2351_v0  ;;  %v1260_v0 = vpop.permute.xlu0 %1259 }
 0x646   :  { %v1262_v10 = vmul.f32 %v1260_v0, %v2551_v62  ;;  %v1263_v14 = vmul.f32 %v1260_v0, %v2556_v4  ;;  %v1454_v62 = vadd.f32 %v1450_v25, %v2569_v31  ;;  %v1449_v4 = vmul.f32 %v1445_v9, %v2571_v34 }
 0x647   :  { %2132 = vmatpush1.bf16.msra.mxu0 %v2418_v23  ;;  %2164 = vmatpush1.bf16.msra.mxu1 %v2422_v27 }
 0x648   :  { %2134 = vmatprep.subr.bf16.mxu0 %v2424_v28  ;;  %2166 = vmatprep.subr.bf16.mxu1 %v2426_v32  ;;  %v1266_v18 = vadd.f32 %v1262_v10, %v2559_v12  ;;  %v1267_v27 = vadd.f32 %v1263_v14, %v2562_v15  ;;  %v1453_v12 = vadd.f32 %v1449_v4, %v2575_v56 }
 0x64b   :  { %2136 = vmatpush1.bf16.msra.mxu0 %v2429_v36  ;;  %2168 = vmatpush1.bf16.msra.mxu1 %v2433_v40 }
 0x64c   :  { %2138 = vmatprep.subr.bf16.mxu0 %v2435_v41  ;;  %2170 = vmatprep.subr.bf16.mxu1 %v2438_v45  ;;  %v1265_v41 = vmul.f32 %v1260_v0, %v2564_v16 }
 0x64f   :  { %2140 = vmatpush1.bf16.msra.mxu0 %v2441_v52  ;;  %2172 = vmatpush1.bf16.msra.mxu1 %v2445_v53  ;;  %v1269_v53 = vadd.f32 %v1265_v41, %v2569_v31 }
 0x650   :  { %2142 = vmatprep.subr.bf16.mxu0 %v2447_v54  ;;  %2174 = vmatprep.subr.bf16.mxu1 %v2450_v58  ;;  %v1264_v54 = vmul.f32 %v1260_v0, %v2571_v34 }
 0x653   :  { %2144 = vmatpush1.bf16.msra.mxu0 %v2453_v1  ;;  %2176 = vmatpush1.bf16.msra.mxu1 %v2457_v2  ;;  %v1268_v1 = vadd.f32 %v1264_v54, %v2575_v56 }
 0x654   :  { %2146 = vmatprep.subr.bf16.mxu0 %v2459_v3  ;;  %2178 = vmatprep.subr.bf16.mxu1 %v2462_v8 }
 0x657   :  { %2148 = vmatpush1.bf16.msra.mxu0 %v2465_v17  ;;  %2180 = vmatpush1.bf16.msra.mxu1 %v2469_v21 }
 0x658   :  { %2150 = vmatprep.subr.bf16.mxu0 %v2471_v22  ;;  %2182 = vmatprep.subr.bf16.mxu1 %v2477_v29 }
 0x65b   :  { %2152 = vmatpush1.bf16.msra.mxu0 %v2483_v38  ;;  %2184 = vmatpush1.bf16.msra.mxu1 %v2487_v39 }
 0x65c   :  { %2154 = vmatprep.subr.bf16.mxu0 %v2489_v42  ;;  %2186 = vmatprep.subr.bf16.mxu1 %v2492_v46 }
 0x65f   :  { %2156 = vmatpush1.bf16.msra.mxu0 %v2498_v50  ;;  %2188 = vmatpush1.bf16.msra.mxu1 %v2502_v51 }
 0x715   :  { %v1336_v19 = vpop.f32.mrb[12].mxu0  ;;  %v1407_v23 = vpop.f32.mrb[12].mxu1 }
 0x716   :  { %v1412_v28 = vadd.f32 %v1336_v19, %v1266_v18  ;;  %v1338_v32 = vpop.f32.mrb[13].mxu0  ;;  %v1409_v36 = vpop.f32.mrb[13].mxu1  ;;  %v1414_v3 = vadd.f32 %v1407_v23, %v1268_v1  ;;  %v1676_v23 = vld [vmem:[%s2885_s4] ss:$0 sm:$0xff] }
 0x717   :  { %v1413_v40 = vadd.f32 %v1338_v32, %v1267_v27  ;;  %v1415_v58 = vadd.f32 %v1409_v36, %v1269_v53  ;;  %v1636_v32 = vstv %s2886_s5 }
 0x718   :  { %v1669_v45 = vmul.f32 -1.442695, %v1412_v28 }
 0x719   :  { %v1670_v52 = vmul.f32 -1.442695, %v1413_v40  ;;  %v1671_v2 = vmul.f32 -1.442695, %v1415_v58 }
 0x71a   :  { %2292 = vpow2.f32 %v1669_v45 }
 0x71b   :  { %2294 = vpow2.f32 %v1670_v52 }
 0x71c   :  { %2296 = vpow2.f32 %v1671_v2 }
 0x71d   :  { %2298 = vtanh.f32 %v1414_v3 }
 0x724   :  { %v2293_v8 = vpop.eup %2292 }
 0x725   :  { %v2295_v17 = vpop.eup %2294  ;;  %v1419_v21 = vadd.f32 1.0, %v2293_v8 }
 0x726   :  { %v1425_v22 = vadd.f32 1.0, %v2295_v17  ;;  %v2297_v29 = vpop.eup %2296 }
 0x727   :  { %2300 = vrcp.f32 %v1419_v21  ;;  %v2299_v38 = vpop.eup %2298  ;;  %v1432_v50 = vadd.f32 1.0, %v2297_v29 }
 0x728   :  { %2302 = vrcp.f32 %v1425_v22 }
 0x729   :  { %2304 = vrcp.f32 %v1432_v50 }
 0x731   :  { %v2301_v39 = vpop.eup %2300 }
 0x732   :  { %v2303_v42 = vpop.eup %2302  ;;  %v1436_v46 = vmul.f32 %v2301_v39, %v2299_v38 }
 0x733   :  { %v1435_v51 = vmul.f32 %v2303_v42, %v2820_v33  ;;  %v2305_v44 = vpop.eup %2304 }
 0x735   :  { %v1437_v60 = vadd.f32 %v1436_v46, %v1435_v51 }
 0x737   :  { %2306 = vtanh.f32 %v1437_v60 }
 0x741   :  { %v2307_v5 = vpop.eup %2306 }
 0x742   :  { %v1439_v48 = vmul.f32 %v2307_v5, %v2305_v44 }
 0x744   :  { %1520 = vmatmul.mubr.f32.vlgmr.msra.gmra.mrb[14].mxu0 %v1439_v48  ;;  %1591 = vmatmul.mubr.f32.vlgmr.msra.gmra.mrb[14].mxu1 %v1439_v48 }
 0x817   :  { %v1521_v61 = vpop.f32.mrb[14].mxu0  ;;  %v1592_v7 = vpop.f32.mrb[14].mxu1 }
 0x818   :  { %v1597_v37 = vadd.f32 %v1521_v61, %v1451_v47  ;;  %v1523_v13 = vpop.f32.mrb[15].mxu0  ;;  %v1594_v20 = vpop.f32.mrb[15].mxu1  ;;  %v1599_v63 = vadd.f32 %v1592_v7, %v1453_v12 }
 0x819   :  { %v1598_v57 = vadd.f32 %v1523_v13, %v1452_v59  ;;  %v1600_v26 = vadd.f32 %v1594_v20, %v1454_v62 }
 0x81a   :  { %v1673_v11 = vmul.f32 -1.442695, %v1597_v37 }
 0x81b   :  { %v1674_v6 = vmul.f32 -1.442695, %v1598_v57  ;;  %v1675_v30 = vmul.f32 -1.442695, %v1600_v26 }
 0x81c   :  { %2308 = vpow2.f32 %v1673_v11 }
 0x81d   :  { %2310 = vpow2.f32 %v1674_v6 }
 0x81e   :  { %2312 = vpow2.f32 %v1675_v30 }
 0x81f   :  { %2314 = vtanh.f32 %v1599_v63 }
 0x826   :  { %v2309_v15 = vpop.eup %2308 }
 0x827   :  { %v2311_v33 = vpop.eup %2310  ;;  %v1604_v24 = vadd.f32 1.0, %v2309_v15 }
 0x828   :  { %v1610_v16 = vadd.f32 1.0, %v2311_v33  ;;  %v2313_v35 = vpop.eup %2312 }
 0x829   :  { %2316 = vrcp.f32 %v1604_v24  ;;  %v2315_v43 = vpop.eup %2314  ;;  %v1617_v14 = vadd.f32 1.0, %v2313_v35 }
 0x82a   :  { %2318 = vrcp.f32 %v1610_v16 }
 0x82b   :  { %2320 = vrcp.f32 %v1617_v14 }
 0x833   :  { %v2317_v0 = vpop.eup %2316 }
 0x834   :  { %v2319_v10 = vpop.eup %2318  ;;  %v1621_v31 = vmul.f32 %v2317_v0, %v2315_v43 }
 0x835   :  { %v1620_v34 = vmul.f32 %v2319_v10, %v1437_v60  ;;  %v2321_v56 = vpop.eup %2320 }
 0x837   :  { %v1622_v18 = vadd.f32 %v1621_v31, %v1620_v34 }
 0x839   :  { %2322 = vtanh.f32 %v1622_v18 }
 0x843   :  { %v2323_v19 = vpop.eup %2322 }
 0x844   :  { %v1624_v27 = vmul.f32 %v2323_v19, %v2321_v56 }
 0x846   :  { %v1632_v28 = vmul.f32 %v1676_v23, %v1624_v27 }
 0x848   :  { %1633 = vadd.xlane.f32.xlu0 %v1632_v28 }
 0x8d5   :  { %v1634_v36 = vpop.xlane.xlu0 %1633 }
 0x8d6   :  { %v1637_v40 = vadd.f32 %v1636_v32, %v1634_v36 }
 0x8d8   :  { %1639 = vst.msk [vmem:[%s2887_s6] sm:$0xff] %vm1638_vm0, %v1637_v40 }
 0x8d9   :  { %1644 = vsyncpa [#allocation4], 1 }

</bundles_post_ra>
